<compile_context>
chip_gen: v6e
topology: v6e:2x2x1
jax: 0.10.0
libtpu: 0.0.40
codegen_flags: <defaults>
</compile_context>

<pallas_src>
import functools
import math

import jax
import jax.numpy as jnp
from jax.experimental import pallas as pl
from jax.experimental.pallas import tpu as pltpu


def _gat_attention_kernel(f1_ref, f2_ref, adj_ref, h_ref, out_ref,
                          m_ref, l_ref, acc_ref, *, negative_slope, approx_recip):
    """One (row-block i, col-block j) step of masked attention with online softmax."""
    j = pl.program_id(1)

    @pl.when(j == 0)
    def _init():
        m_ref[...] = jnp.full(m_ref.shape, -jnp.inf, dtype=m_ref.dtype)
        l_ref[...] = jnp.zeros(l_ref.shape, dtype=l_ref.dtype)
        acc_ref[...] = jnp.zeros(acc_ref.shape, dtype=acc_ref.dtype)

    # e[r, c] = leaky_relu(f1[r] + f2[c]); masked entries are set to 0 (NOT -inf) per the
    # reference, and intentionally take part in the softmax denominator below.
    e = f1_ref[...] + f2_ref[...]                       # (TM, 1) + (1, TN) -> (TM, TN), f32
    e = jnp.where(e > 0, e, negative_slope * e)
    e = jnp.where(adj_ref[...] > 0, e, 0.0)

    # Online softmax update over column blocks.
    m_prev = m_ref[...]
    m_new = jnp.maximum(m_prev, jnp.max(e, axis=1, keepdims=True))
    alpha = jnp.exp(m_prev - m_new)
    p = jnp.exp(e - m_new)
    l_ref[...] = alpha * l_ref[...] + jnp.sum(p, axis=1, keepdims=True)
    acc_ref[...] = alpha * acc_ref[...] + jnp.dot(
        p.astype(h_ref.dtype), h_ref[...], preferred_element_type=jnp.float32)
    m_ref[...] = m_new

    @pl.when(j == pl.num_programs(1) - 1)
    def _finalize():
        inv_l = pl.reciprocal(l_ref[...], approx=approx_recip)
        out_ref[...] = (acc_ref[...] * inv_l).astype(out_ref.dtype)


def _pick_tile(n, candidates, align):
    for t in candidates:
        if t <= n and n % t == 0 and t % align == 0:
            return t
    return n  # fall back to the full dimension (always a legal block shape)


def graph_attention_layer(x, adj, weight, a, *, negative_slope=0.2,
                          mxu_dtype=jnp.bfloat16, approx_recip=True):
    N, in_features = x.shape
    out_features = weight.shape[1]
    f32 = jnp.float32

    # --- Hoisted out of the tile loop (plain XLA ops) ---------------------------------
    h = jnp.dot(x.astype(f32), weight.astype(f32))                  # (N, F)
    # One (F, 2) matmul instead of two skinny (F, 1) matmuls: col0 = h·a1, col1 = h·a2.
    a_cat = a.reshape(2, out_features).T.astype(f32)                # (F, 2)
    scores = jnp.dot(h, a_cat)                                      # (N, 2)
    f1 = scores[:, 0:1]                                             # (N, 1), source-node term
    f2_row = jnp.transpose(scores[:, 1:2])                          # (1, N), target-node term

    # Lane-dense output: pad the feature dim to a multiple of 128 (sliced off at the end).
    f_pad = max(128, ((out_features + 127) // 128) * 128)
    h_mxu = h.astype(mxu_dtype)
    if f_pad != out_features:
        h_mxu = jnp.pad(h_mxu, ((0, 0), (0, f_pad - out_features)))

    # Stream the adjacency as a bf16 0/1 mask: halves the dominant N^2 HBM traffic.
    adj_mask = (adj > 0).astype(jnp.bfloat16)

    # Tile sizes: multiples of (8, 128) that divide N; otherwise fall back to full N.
    # TODO(synk): ragged N (not a multiple of 8/128) currently falls back to a single block.
    tm = _pick_tile(N, (512, 256, 128, 64, 32, 16, 8), 8)
    tn = _pick_tile(N, (512, 256, 128), 128)
    grid = (N // tm, N // tn)

    itemsize = lambda arr: arr.dtype.itemsize
    cost = pl.CostEstimate(
        flops=2 * N * N * f_pad + 10 * N * N,
        transcendentals=2 * N * N,
        bytes_accessed=(adj_mask.size * itemsize(adj_mask)
                        + (N // tm) * N * f_pad * itemsize(h_mxu)
                        + N * f_pad * 4 + 3 * N * 4),
    )

    kernel = functools.partial(
        _gat_attention_kernel,
        negative_slope=negative_slope,
        approx_recip=approx_recip,
    )

    out_padded = pl.pallas_call(
        kernel,
        out_shape=jax.ShapeDtypeStruct((N, f_pad), f32),
        grid_spec=pltpu.PrefetchScalarGridSpec(
            num_scalar_prefetch=0,
            grid=grid,
            in_specs=[
                pl.BlockSpec((tm, 1), lambda i, j: (i, 0)),       # f1   (row-block scores)
                pl.BlockSpec((1, tn), lambda i, j: (0, j)),       # f2   (col-block scores, row layout)
                pl.BlockSpec((tm, tn), lambda i, j: (i, j)),      # adj mask tile (bf16)
                pl.BlockSpec((tn, f_pad), lambda i, j: (j, 0)),   # h column block for PV matmul
            ],
            out_specs=pl.BlockSpec((tm, f_pad), lambda i, j: (i, 0)),
            scratch_shapes=[
                pltpu.VMEM((tm, 1), f32),       # running max
                pltpu.VMEM((tm, 1), f32),       # running denominator
                pltpu.VMEM((tm, f_pad), f32),   # running numerator
            ],
        ),
        compiler_params=pltpu.CompilerParams(
            dimension_semantics=("parallel", "arbitrary"),
        ),
        cost_estimate=cost,
    )(f1, f2_row, adj_mask, h_mxu)

    return out_padded[:, :out_features]


def gat_reference(x, adj, weight, a, *, negative_slope=0.2):
    """Pure-JAX reference mirroring the PyTorch forward exactly."""
    h = x @ weight
    N, F_out = h.shape
    a_input = jnp.concatenate(
        [jnp.repeat(h, N, axis=0), jnp.tile(h, (N, 1))], axis=1
    ).reshape(N, N, 2 * F_out)
    e = jnp.squeeze(a_input @ a, axis=2)
    e = jnp.where(e > 0, e, negative_slope * e)
    att = jnp.where(adj > 0, e, jnp.zeros_like(e))
    att = jax.nn.softmax(att, axis=1)
    return att @ h


if __name__ == "__main__":
    N = 384            # number of nodes (exercises a 3x3 tiled grid: tm=tn=128)
    in_features = 16
    out_features = 64  # exercises lane-padding of the output feature dim to 128
    negative_slope = 0.2

    key = jax.random.PRNGKey(0)
    k_x, k_adj, k_w, k_a = jax.random.split(key, 4)

    x = jax.random.normal(k_x, (N, in_features), dtype=jnp.float32)
    adj = (jax.random.uniform(k_adj, (N, N)) > 0.5).astype(jnp.float32)

    # Deterministic xavier_normal_-style init (gain=1.414)
    gain = 1.414
    std_w = gain * math.sqrt(2.0 / (in_features + out_features))
    weight = std_w * jax.random.normal(k_w, (in_features, out_features), dtype=jnp.float32)
    std_a = gain * math.sqrt(2.0 / (2 * out_features + 1))
    a = std_a * jax.random.normal(k_a, (2 * out_features, 1), dtype=jnp.float32)

    ref = gat_reference(x, adj, weight, a, negative_slope=negative_slope)

    # Exact-mode check: f32 MXU operands, exact reciprocal.
    out_f32 = graph_attention_layer(x, adj, weight, a, negative_slope=negative_slope,
                                    mxu_dtype=jnp.float32, approx_recip=False)
    out_f32 = jax.block_until_ready(out_f32)
    assert out_f32.shape == (N, out_features)
    assert jnp.allclose(out_f32, ref, atol=1e-4, rtol=1e-4), "f32 kernel mismatch vs reference"

    # Fast default: bf16 MXU operands for att@h, approximate reciprocal.
    out_fast = graph_attention_layer(x, adj, weight, a, negative_slope=negative_slope)
    out_fast = jax.block_until_ready(out_fast)
    assert out_fast.shape == (N, out_features)
    max_err = float(jnp.max(jnp.abs(out_fast - ref)))
    assert max_err < 5e-2, f"bf16 kernel too far from reference: max abs err {max_err}"

    print("KERNEL_OK")
</pallas_src>

<mosaic_0001>
module attributes {stable_mosaic.version = 11 : i64} {
  func.func @_gat_attention_kernel(%arg0: i32, %arg1: i32, %arg2: memref<128x1xf32, #tpu.memory_space<vmem>>, %arg3: memref<1x128xf32, #tpu.memory_space<vmem>>, %arg4: memref<128x128xbf16, #tpu.memory_space<vmem>>, %arg5: memref<128x128xf32, #tpu.memory_space<vmem>>, %arg6: memref<128x128xf32, #tpu.memory_space<vmem>>, %arg7: memref<128x1xf32, #tpu.memory_space<vmem>>, %arg8: memref<128x1xf32, #tpu.memory_space<vmem>>, %arg9: memref<128x128xf32, #tpu.memory_space<vmem>>) attributes {dimension_semantics = [#tpu.dimension_semantics<parallel>, #tpu.dimension_semantics<arbitrary>], iteration_bounds = array<i64: 3, 3>, scalar_prefetch = 0 : i64, scratch_operands = 3 : i64, tpu.core_type = #tpu.core_type<tc>, window_params = [{transform_indices = @transform_0, window_bounds = array<i64: 128, 1>}, {transform_indices = @transform_1, window_bounds = array<i64: 1, 128>}, {transform_indices = @transform_2, window_bounds = array<i64: 128, 128>}, {transform_indices = @transform_3, window_bounds = array<i64: 128, 128>}, {transform_indices = @transform_4, window_bounds = array<i64: 128, 128>}]} {
    %c0_i32 = arith.constant 0 : i32
    %0 = arith.cmpi eq, %arg1, %c0_i32 : i32
    %1 = arith.extui %0 : i1 to i32
    %c0_i32_0 = arith.constant 0 : i32
    %2 = arith.cmpi ne, %1, %c0_i32_0 : i32
    scf.if %2 {
      %cst_27 = arith.constant 0xFF800000 : f32
      %44 = vector.broadcast %cst_27 : f32 to vector<128x1xf32>
      %c0_28 = arith.constant 0 : index
      %c0_29 = arith.constant 0 : index
      %45 = vector.load %arg7[%c0_28, %c0_29] : memref<128x1xf32, #tpu.memory_space<vmem>>, vector<128x1xf32>
      tpu.vector_store %arg7[%c0_28, %c0_29], %44 {strides = array<i32>} : memref<128x1xf32, #tpu.memory_space<vmem>>, vector<128x1xf32>,
      %cst_30 = arith.constant 0.000000e+00 : f32
      %46 = vector.broadcast %cst_30 : f32 to vector<128x1xf32>
      %c0_31 = arith.constant 0 : index
      %c0_32 = arith.constant 0 : index
      %47 = vector.load %arg8[%c0_31, %c0_32] : memref<128x1xf32, #tpu.memory_space<vmem>>, vector<128x1xf32>
      tpu.vector_store %arg8[%c0_31, %c0_32], %46 {strides = array<i32>} : memref<128x1xf32, #tpu.memory_space<vmem>>, vector<128x1xf32>,
      %cst_33 = arith.constant 0.000000e+00 : f32
      %48 = vector.broadcast %cst_33 : f32 to vector<128x128xf32>
      %c0_34 = arith.constant 0 : index
      %c0_35 = arith.constant 0 : index
      %49 = vector.load %arg9[%c0_34, %c0_35] : memref<128x128xf32, #tpu.memory_space<vmem>>, vector<128x128xf32>
      tpu.vector_store %arg9[%c0_34, %c0_35], %48 {strides = array<i32>} : memref<128x128xf32, #tpu.memory_space<vmem>>, vector<128x128xf32>,
    } else {
    }
    %c0 = arith.constant 0 : index
    %c0_1 = arith.constant 0 : index
    %3 = vector.load %arg2[%c0, %c0_1] : memref<128x1xf32, #tpu.memory_space<vmem>>, vector<128x1xf32>
    %c0_2 = arith.constant 0 : index
    %c0_3 = arith.constant 0 : index
    %4 = vector.load %arg3[%c0_2, %c0_3] : memref<1x128xf32, #tpu.memory_space<vmem>>, vector<1x128xf32>
    %5 = vector.broadcast %3 : vector<128x1xf32> to vector<128x128xf32>
    %6 = vector.broadcast %4 : vector<1x128xf32> to vector<128x128xf32>
    %7 = arith.addf %5, %6 : vector<128x128xf32>
    %cst = arith.constant 0.000000e+00 : f32
    %8 = vector.broadcast %cst : f32 to vector<128x128xf32>
    %9 = arith.cmpf ogt, %7, %8 : vector<128x128xf32>
    %cst_4 = arith.constant 2.000000e-01 : f32
    %10 = vector.broadcast %cst_4 : f32 to vector<128x128xf32>
    %11 = arith.mulf %10, %7 : vector<128x128xf32>
    %12 = arith.select %9, %7, %11 : vector<128x128xi1>, vector<128x128xf32>
    %c0_5 = arith.constant 0 : index
    %c0_6 = arith.constant 0 : index
    %13 = vector.load %arg4[%c0_5, %c0_6] : memref<128x128xbf16, #tpu.memory_space<vmem>>, vector<128x128xbf16>
    %cst_7 = arith.constant 0.000000e+00 : bf16
    %14 = vector.broadcast %cst_7 : bf16 to vector<128x128xbf16>
    %15 = arith.cmpf ogt, %13, %14 : vector<128x128xbf16>
    %cst_8 = arith.constant 0.000000e+00 : f32
    %16 = vector.broadcast %cst_8 : f32 to vector<128x128xf32>
    %17 = arith.select %15, %12, %16 : vector<128x128xi1>, vector<128x128xf32>
    %c0_9 = arith.constant 0 : index
    %c0_10 = arith.constant 0 : index
    %18 = vector.load %arg7[%c0_9, %c0_10] : memref<128x1xf32, #tpu.memory_space<vmem>>, vector<128x1xf32>
    %cst_11 = arith.constant dense<0xFF800000> : vector<128xf32>
    %19 = vector.multi_reduction <maximumf>, %17, %cst_11 [1] : vector<128x128xf32> to vector<128xf32>
    %20 = vector.shape_cast %19 : vector<128xf32> to vector<128x1xf32>
    %21 = arith.maximumf %18, %20 : vector<128x1xf32>
    %22 = arith.subf %18, %21 : vector<128x1xf32>
    %23 = math.exp %22 : vector<128x1xf32>
    %24 = vector.broadcast %21 : vector<128x1xf32> to vector<128x128xf32>
    %25 = arith.subf %17, %24 : vector<128x128xf32>
    %26 = math.exp %25 : vector<128x128xf32>
    %c0_12 = arith.constant 0 : index
    %c0_13 = arith.constant 0 : index
    %27 = vector.load %arg8[%c0_12, %c0_13] : memref<128x1xf32, #tpu.memory_space<vmem>>, vector<128x1xf32>
    %28 = arith.mulf %23, %27 : vector<128x1xf32>
    %cst_14 = arith.constant dense<0.000000e+00> : vector<128xf32>
    %29 = vector.multi_reduction <add>, %26, %cst_14 [1] : vector<128x128xf32> to vector<128xf32>
    %30 = vector.shape_cast %29 : vector<128xf32> to vector<128x1xf32>
    %31 = arith.addf %28, %30 : vector<128x1xf32>
    %c0_15 = arith.constant 0 : index
    %c0_16 = arith.constant 0 : index
    %32 = vector.load %arg8[%c0_15, %c0_16] : memref<128x1xf32, #tpu.memory_space<vmem>>, vector<128x1xf32>
    tpu.vector_store %arg8[%c0_15, %c0_16], %31 {strides = array<i32>} : memref<128x1xf32, #tpu.memory_space<vmem>>, vector<128x1xf32>,
    %c0_17 = arith.constant 0 : index
    %c0_18 = arith.constant 0 : index
    %33 = vector.load %arg9[%c0_17, %c0_18] : memref<128x128xf32, #tpu.memory_space<vmem>>, vector<128x128xf32>
    %34 = vector.broadcast %23 : vector<128x1xf32> to vector<128x128xf32>
    %35 = arith.mulf %34, %33 : vector<128x128xf32>
    %c0_19 = arith.constant 0 : index
    %c0_20 = arith.constant 0 : index
    %36 = vector.load %arg5[%c0_19, %c0_20] : memref<128x128xf32, #tpu.memory_space<vmem>>, vector<128x128xf32>
    %cst_21 = arith.constant dense<0.000000e+00> : vector<128x128xf32>
    %37 = tpu.matmul %26, %36, %cst_21 {dimension_numbers = #tpu.dot_dimension_numbers<[1], [0], [0], [1], [0, 0, 1, 1], [], []>} : vector<128x128xf32>, vector<128x128xf32>, vector<128x128xf32> -> vector<128x128xf32>
    %38 = arith.addf %35, %37 : vector<128x128xf32>
    %c0_22 = arith.constant 0 : index
    %c0_23 = arith.constant 0 : index
    %39 = vector.load %arg9[%c0_22, %c0_23] : memref<128x128xf32, #tpu.memory_space<vmem>>, vector<128x128xf32>
    tpu.vector_store %arg9[%c0_22, %c0_23], %38 {strides = array<i32>} : memref<128x128xf32, #tpu.memory_space<vmem>>, vector<128x128xf32>,
    %c0_24 = arith.constant 0 : index
    %c0_25 = arith.constant 0 : index
    %40 = vector.load %arg7[%c0_24, %c0_25] : memref<128x1xf32, #tpu.memory_space<vmem>>, vector<128x1xf32>
    tpu.vector_store %arg7[%c0_24, %c0_25], %21 {strides = array<i32>} : memref<128x1xf32, #tpu.memory_space<vmem>>, vector<128x1xf32>,
    %c2_i32 = arith.constant 2 : i32
    %41 = arith.cmpi eq, %arg1, %c2_i32 : i32
    %42 = arith.extui %41 : i1 to i32
    %c0_i32_26 = arith.constant 0 : i32
    %43 = arith.cmpi ne, %42, %c0_i32_26 : i32
    scf.if %43 {
      %c0_27 = arith.constant 0 : index
      %c0_28 = arith.constant 0 : index
      %44 = vector.load %arg8[%c0_27, %c0_28] : memref<128x1xf32, #tpu.memory_space<vmem>>, vector<128x1xf32>
      %45 = tpu.reciprocal %44 : vector<128x1xf32> -> vector<128x1xf32>
      %c0_29 = arith.constant 0 : index
      %c0_30 = arith.constant 0 : index
      %46 = vector.load %arg9[%c0_29, %c0_30] : memref<128x128xf32, #tpu.memory_space<vmem>>, vector<128x128xf32>
      %47 = vector.broadcast %45 : vector<128x1xf32> to vector<128x128xf32>
      %48 = arith.mulf %46, %47 : vector<128x128xf32>
      %c0_31 = arith.constant 0 : index
      %c0_32 = arith.constant 0 : index
      %49 = vector.load %arg6[%c0_31, %c0_32] : memref<128x128xf32, #tpu.memory_space<vmem>>, vector<128x128xf32>
      tpu.vector_store %arg6[%c0_31, %c0_32], %48 {strides = array<i32>} : memref<128x128xf32, #tpu.memory_space<vmem>>, vector<128x128xf32>,
    } else {
    }
    return
  }
  func.func @transform_0(%arg0: i32, %arg1: i32) -> (i32, i32) {
    %c0_i32 = arith.constant 0 : i32
    %c0_i32_0 = arith.constant 0 : i32
    return %arg0, %c0_i32 : i32, i32
  }
  func.func @transform_1(%arg0: i32, %arg1: i32) -> (i32, i32) {
    %c0_i32 = arith.constant 0 : i32
    %c0_i32_0 = arith.constant 0 : i32
    return %c0_i32, %arg1 : i32, i32
  }
  func.func @transform_2(%arg0: i32, %arg1: i32) -> (i32, i32) {
    %c0_i32 = arith.constant 0 : i32
    return %arg0, %arg1 : i32, i32
  }
  func.func @transform_3(%arg0: i32, %arg1: i32) -> (i32, i32) {
    %c0_i32 = arith.constant 0 : i32
    %c0_i32_0 = arith.constant 0 : i32
    return %arg1, %c0_i32 : i32, i32
  }
  func.func @transform_4(%arg0: i32, %arg1: i32) -> (i32, i32) {
    %c0_i32 = arith.constant 0 : i32
    %c0_i32_0 = arith.constant 0 : i32
    return %arg0, %c0_i32 : i32, i32
  }
}

</mosaic_0001>

<bundles_post_ra>
// kernel: tpu_custom_call.1
= control target key start
LH: loop header
LB: loop body
LE: loop exit
PB: predicated region body
PF: predicated region fallthrough
CT: control target
= control target key end

     0   :  { %s2872_s0 = inlined_call_operand.vmem [shape: f32[384,1], index: 0, kind: input, shape index: {}]   ;;  %s2873_s1 = inlined_call_operand.vmem [shape: f32[1,384], index: 1, kind: input, shape index: {}]   ;;  %s2874_s2 = inlined_call_operand.hbm [shape: bf16[384,384], index: 2, kind: input, shape index: {}]   ;;  %s2875_s3 = inlined_call_operand.vmem [shape: f32[384,128], index: 3, kind: input, shape index: {}]   ;;  %s2876_s4 = inlined_call_operand.hbm [shape: f32[384,128], index: 4, kind: output, shape index: {}]  }
   0x1   :  { %2882 = sst [smem:[#allocation17_spill]] %s2874_s2 }
   0x2   :  { %9 = vsyncpa [#allocation6], 0 }
   0x3   :  { %11 = vsyncpa [#allocation6 + $0x1], 0 }
   0x4   :  { %12 = vsyncpa [#allocation7], 0 }
   0x5   :  { %14 = vsyncpa [#allocation7 + $0x1], 0  ;;  %s2108_s15 = smov 0   ;;  %s2110_s16 = smov 0  }
   0x6   :  { %s2112_s17 = smov 0   ;;  %s2114_s18 = smov 0  }
   0x7   :  { %s2116_s19 = smov 0   ;;  %s2118_s20 = smov 0  }
   0x8   :  { %s2120_s21 = smov 0   ;;  %s2122_s22 = smov 0  }
   0x9   :  { %s2124_s23 = smov 0   ;;  %s2126_s24 = smov 0  }
   0xa   :  { %s2128_s25 = smov 0  }
   0xb LB: > { %2883 = sst [smem:[#allocation11_spill]] %s2050_s20  ;;  %s1566_s26 = sadd.s32 4294967295, %s2070_s25   ;;  %s2070_s25 = sphi %s2128_s25, %s20_s25   ;;  %s2066_s24 = sphi %s2126_s24, %s2927_s24   ;;  %s2062_s23 = sphi %s2124_s23, %s2934_s23   ;;  %s2058_s22 = sphi %s2122_s22, %s2925_s22   ;;  %s2054_s21 = sphi %s2120_s21, %s2933_s21   ;;  %s2050_s20 = sphi %s2118_s20, %s2924_s20   ;;  %s2046_s19 = sphi %s2116_s19, %s2932_s19   ;;  %s2042_s18 = sphi %s2114_s18, %s2931_s18   ;;  %s2038_s17 = sphi %s2112_s17, %s2930_s17   ;;  %s2034_s16 = sphi %s2110_s16, %s2929_s16   ;;  %s2030_s15 = sphi %s2108_s15, %s2928_s15  }
   0xc   : > { %2884 = sst [smem:[#allocation12_spill]] %s2066_s24  ;;  %s1567_s27 = sadd.s32 4294967294, %s2070_s25  }
   0xd   : > { %s29_s28 = sadd.s32 1, %s2062_s23  ;;  %s32_s29 = sadd.s32 1, %s2066_s24 }
   0xe   : > { %p30_p0 = scmp.ge.s32.totalorder %s29_s28, 3  ;;  %s93_s30 = sadd.s32 1, %s2050_s20 }
   0xf   : > { %p100_p1 = scmp.ne.s32.totalorder %s2050_s20, %s2046_s19  ;;  %p101_p2 = scmp.eq.s32.totalorder %s2070_s25, 0 }
  0x10   : > { %s2936_s28 = smov (%p30_p0, %s29_s28), 0  ;;  %s2938_s29 = smov (!%p30_p0, %s32_s29), %s2066_s24 }
  0x11   : > { %2885 = sst [smem:[#allocation13_spill]] %s2936_s28  ;;  %s89_s5 = ssub.s32 %s2062_s23, %s2936_s28 }
  0x12   : > { %p2174_p3 = por %p101_p2, %p100_p1  ;;  %p34_p4 = scmp.ge.s32.totalorder %s2938_s29, 3 }
  0x13   : > { %p106_p5 = scmp.ne.s32.totalorder %s2046_s19, %s2042_s18  ;;  %p107_p6 = scmp.eq.s32.totalorder %s1566_s26, 0 }
  0x14   : > { %s145_s7 = sadd.s32 1, %s2038_s17  ;;  %s2940_s29 = smov (%p34_p4, %s2938_s29), 0 }
  0x15   : > { %2887 = sst [smem:[#allocation14_spill]] %s2940_s29  ;;  %p2182_p7 = por %p107_p6, %p106_p5 }
  0x16   : > { %p155_p8 = scmp.ne.s32.totalorder %s2038_s17, %s2034_s16  ;;  %s88_s9 = ssub.s32 %s2066_s24, %s2940_s29 }
  0x17   : > { %p156_p9 = scmp.eq.s32.totalorder %s1566_s26, 8  ;;  %s90_s10 = sor.u32 %s89_s5, %s88_s9 }
  0x18   : > { %p143_p10 = scmp.eq.s32.totalorder %s88_s9, 0  ;;  %p91_p11 = scmp.eq.s32.totalorder %s90_s10, 0 }
  0x19   : > { %p2190_p12 = por %p156_p9, %p155_p8  ;;  %p161_p13 = scmp.ne.s32.totalorder %s2034_s16, %s2030_s15 }
  0x1a   : > { %s2195_s12 = scalar_select %p143_p10, %s2038_s17, %s145_s7  }
  0x1b   : > { %s2198_s13 = scalar_select %p91_p11, %s2050_s20, %s93_s30  }
  0x1c   : > { %2890 = sst [smem:[#allocation15_spill]] %s2195_s12  ;;  %p162_p0 = scmp.eq.s32.totalorder %s1567_s27, 8 }
  0x1d   : > { %2891 = sst [smem:[#allocation16_spill]] %s2198_s13  ;;  %p1723_p1 = scmp.lt.s32.totalorder %s2070_s25, 9 }
  0x1e   : > { %p2203_p2 = por %p162_p0, %p161_p13  ;;  %s197_s18 = sand.u32 1, %s2050_s20  }
  0x1f   : > { %s1570_s26 = sshll.u32 %s197_s18, 6  ;;  %s1710_s5 = smul.u32 48, %s2066_s24 }
  0x20   : > { %s201_s9 = scalar_lea.vmem [#allocation5], %s1570_s26  ;;  %p2211_p4 = pnand %p1723_p1, %p2174_p3 }
  0x21   : > { %s210_s10 = sshll.u32 %s201_s9, 4  ;;  %s207_s30 = sadd.s32 %s2062_s23, %s1710_s5  ;;  %s211_s10 = int_to_ptr.vmem [resolvable:$true] %s210_s10 }
  0x22   : > { %s1573_s7 = sshll.u32 %s207_s30, 6  ;;  %s2894_s2 = sld [smem:[#allocation17_spill]] }
  0x23   : > { %s198_s12 = scalar_lea.sflag [#allocation6], %s197_s18  ;;  %p1924_p5 = pneg %p2211_p4 }
  0x24   : > { %s1935_s20 = scalar_lea.vmem %s211_s10, 1024  ;;  %s2072_s6 = smov [#allocation5]  }
  0x25   : > { %p1936_p6 = scmp.ne.s32.totalorder %s211_s10, %s1935_s20  ;;  %s1940_s26 = sshll.u32 %s2072_s6, 4  ;;  %s1941_s26 = int_to_ptr.vmem [resolvable:$false] %s1940_s26 }
  0x26   : > { %s1942_s9 = scalar_lea.vmem %s1941_s26, 2048  ;;  %p1943_p3 = scmp.lt.s32.totalorder %s211_s10, %s1941_s26 }
  0x27   : > { %p1938_p8 = pnand %p1936_p6, %p1924_p5  ;;  %p1944_p10 = scmp.lt.s32.totalorder %s1942_s9, %s1935_s20 }
  0x28   : > { %s209_s13 = scalar_lea.hbm %s2894_s2, %s1573_s7 }
  0x29   : > { %p1939_p9 = pneg %p1938_p8  ;;  %p1945_p11 = por %p1944_p10, %p1943_p3 }
  0x2b   : > { %p1946_p13 = pnand %p1945_p11, %p1939_p9 }
  0x2d   : > { %1949 = shalt.err (!%p1946_p13)
}
  0x2e   : > { %s2073_s5 = smov 192   ;;  %s2074_s28 = smov 64  }
  0x2f   : > { %s2075_s18 = smov 4   ;;  %p1574_p0 = scmp.ge.s32.totalorder %s2070_s25, 1 }
  0x30   : > { %1718 = dma.hbm_to_vmem [thread:$0]  (!%p2211_p4), %s209_s13, 1024, %s211_s10, %s198_s12, %s2073_s5, %s2074_s28, %s2075_s18  }
  0x31   : > { %p227_p1 = scmp.lt.s32.totalorder %s2070_s25, 10 }
  0x33   : > { %p228_p5 = pnand %p1574_p0, %p227_p1 }
  0x34   : > { %s233_s30 = sand.u32 (!%p228_p5), 1, %s2046_s19  }
  0x35   : > { %231 = sbr.rel (%p228_p5) target bundleno = 939 (0x3ab), region = 36  ;;  %s1575_s7 = sshll.u32 (!%p228_p5), %s233_s30, 6 }
  0x36   : > { %s234_s20 = scalar_lea.sflag (!%p228_p5), [#allocation6], %s233_s30  ;;  %s2226_s27 = scalar_lea.vmem (!%p228_p5), [#allocation5], %s1575_s7 }
  0x3a   : > { %2021 = dma.done.wait (%p2182_p7), %s234_s20, 1024  }
  0x3b   : > { %2023 = vsyncadd (%p2182_p7), %s234_s20, 4294966272  ;;  %s2880_s29 = sand.u32 1, %s2034_s16   ;;  %s1577_s12 = sshll.u32 %s2058_s22, 4 }
  0x3c   : > { %s1576_s13 = sshll.u32 %s2880_s29, 7  ;;  %p276_p4 = scmp.lt.s32.totalorder %s1577_s12, 47 }
  0x3d   : > { %p281_p6 = scmp.lt.s32.totalorder %s2054_s21, 2  ;;  %s1579_s26 = sshll.u32 %s2054_s21, 4 }
  0x3e   : > { %s2942_s12 = smov (!%p276_p4, %s1577_s12), 47  ;;  %p286_p7 = scmp.lt.s32.totalorder %s1579_s26, 47 }
  0x3f   : > { %s2238_s10 = scalar_select %p281_p6, %s2054_s21, 2 }
  0x40   : > { %s1578_s6 = sshll.u32 %s2942_s12, 3  ;;  %s2944_s26 = smov (!%p286_p7, %s1579_s26), 47 }
  0x41   : > { %s2244_s5 = scalar_lea.vmem %s2872_s0, %s1578_s6  ;;  %s283_s30 = scalar_lea.vmem %s2873_s1, %s2238_s10 }
  0x42   : > { %s1580_s7 = sshll.u32 %s2944_s26, 3  ;;  %s2255_s24 = scalar_lea.vmem [#allocation8], %s1576_s13 }
  0x43   : > { %s2253_s2 = scalar_lea.vmem %s2875_s3, %s1580_s7  ;;  %p1581_p8 = scmp.ne.s32.totalorder %s2054_s21, 0 }
  0x45   : > { %298 = sbr.rel (%p1581_p8) target bundleno = 99 (0x63), region = 44 }
  0x4a   : > { %vm299_vm0 = vcmask 7168   ;;  %v2076_v0 = vmov -inf   ;;  %v2077_v1 = vmov 0.0  }
  0x4b   : > { %300 = vst.msk [vmem:[#allocation2] sm:$0xff] %vm299_vm0, %v2076_v0  ;;  %301 = vst.msk [vmem:[#allocation2 + $0x8] sm:$0xff] %vm299_vm0, %v2076_v0 }
  0x4c   : > { %302 = vst.msk [vmem:[#allocation2 + $0x10] sm:$0xff] %vm299_vm0, %v2076_v0  ;;  %303 = vst.msk [vmem:[#allocation2 + $0x18] sm:$0xff] %vm299_vm0, %v2076_v0 }
  0x4d   : > { %304 = vst.msk [vmem:[#allocation2 + $0x20] sm:$0xff] %vm299_vm0, %v2076_v0  ;;  %305 = vst.msk [vmem:[#allocation2 + $0x28] sm:$0xff] %vm299_vm0, %v2076_v0 }
  0x4e   : > { %306 = vst.msk [vmem:[#allocation2 + $0x30] sm:$0xff] %vm299_vm0, %v2076_v0  ;;  %307 = vst.msk [vmem:[#allocation2 + $0x38] sm:$0xff] %vm299_vm0, %v2076_v0 }
  0x4f   : > { %308 = vst.msk [vmem:[#allocation2 + $0x40] sm:$0xff] %vm299_vm0, %v2076_v0  ;;  %309 = vst.msk [vmem:[#allocation2 + $0x48] sm:$0xff] %vm299_vm0, %v2076_v0 }
  0x50   : > { %310 = vst.msk [vmem:[#allocation2 + $0x50] sm:$0xff] %vm299_vm0, %v2076_v0  ;;  %311 = vst.msk [vmem:[#allocation2 + $0x58] sm:$0xff] %vm299_vm0, %v2076_v0 }
  0x51   : > { %312 = vst.msk [vmem:[#allocation2 + $0x60] sm:$0xff] %vm299_vm0, %v2076_v0  ;;  %313 = vst.msk [vmem:[#allocation2 + $0x68] sm:$0xff] %vm299_vm0, %v2076_v0 }
  0x52   : > { %314 = vst.msk [vmem:[#allocation2 + $0x70] sm:$0xff] %vm299_vm0, %v2076_v0  ;;  %315 = vst.msk [vmem:[#allocation2 + $0x78] sm:$0xff] %vm299_vm0, %v2076_v0 }
  0x53   : > { %316 = vst.msk [vmem:[#allocation3] sm:$0xff] %vm299_vm0, %v2077_v1  ;;  %317 = vst.msk [vmem:[#allocation3 + $0x8] sm:$0xff] %vm299_vm0, %v2077_v1 }
  0x54   : > { %318 = vst.msk [vmem:[#allocation3 + $0x10] sm:$0xff] %vm299_vm0, %v2077_v1  ;;  %319 = vst.msk [vmem:[#allocation3 + $0x18] sm:$0xff] %vm299_vm0, %v2077_v1 }
  0x55   : > { %320 = vst.msk [vmem:[#allocation3 + $0x20] sm:$0xff] %vm299_vm0, %v2077_v1  ;;  %321 = vst.msk [vmem:[#allocation3 + $0x28] sm:$0xff] %vm299_vm0, %v2077_v1 }
  0x56   : > { %322 = vst.msk [vmem:[#allocation3 + $0x30] sm:$0xff] %vm299_vm0, %v2077_v1  ;;  %323 = vst.msk [vmem:[#allocation3 + $0x38] sm:$0xff] %vm299_vm0, %v2077_v1 }
  0x57   : > { %324 = vst.msk [vmem:[#allocation3 + $0x40] sm:$0xff] %vm299_vm0, %v2077_v1  ;;  %325 = vst.msk [vmem:[#allocation3 + $0x48] sm:$0xff] %vm299_vm0, %v2077_v1 }
  0x58   : > { %326 = vst.msk [vmem:[#allocation3 + $0x50] sm:$0xff] %vm299_vm0, %v2077_v1  ;;  %327 = vst.msk [vmem:[#allocation3 + $0x58] sm:$0xff] %vm299_vm0, %v2077_v1 }
  0x59   : > { %328 = vst.msk [vmem:[#allocation3 + $0x60] sm:$0xff] %vm299_vm0, %v2077_v1  ;;  %329 = vst.msk [vmem:[#allocation3 + $0x68] sm:$0xff] %vm299_vm0, %v2077_v1 }
  0x5a   : > { %330 = vst.msk [vmem:[#allocation3 + $0x70] sm:$0xff] %vm299_vm0, %v2077_v1  ;;  %331 = vst.msk [vmem:[#allocation3 + $0x78] sm:$0xff] %vm299_vm0, %v2077_v1 }
  0x5b   : > { %332 = vst [vmem:[#allocation4 + $0x30] sm:$0xff] %v2077_v1  ;;  %333 = vst [vmem:[#allocation4] sm:$0xff] %v2077_v1 }
  0x5c   : > { %334 = vst [vmem:[#allocation4 + $0x58] sm:$0xff] %v2077_v1  ;;  %335 = vst [vmem:[#allocation4 + $0x18] sm:$0xff] %v2077_v1 }
  0x5d   : > { %336 = vst [vmem:[#allocation4 + $0x50] sm:$0xff] %v2077_v1  ;;  %337 = vst [vmem:[#allocation4 + $0x68] sm:$0xff] %v2077_v1 }
  0x5e   : > { %338 = vst [vmem:[#allocation4 + $0x8] sm:$0xff] %v2077_v1  ;;  %339 = vst [vmem:[#allocation4 + $0x48] sm:$0xff] %v2077_v1 }
  0x5f   : > { %340 = vst [vmem:[#allocation4 + $0x40] sm:$0xff] %v2077_v1  ;;  %341 = vst [vmem:[#allocation4 + $0x20] sm:$0xff] %v2077_v1 }
  0x60   : > { %342 = vst [vmem:[#allocation4 + $0x10] sm:$0xff] %v2077_v1  ;;  %343 = vst [vmem:[#allocation4 + $0x38] sm:$0xff] %v2077_v1 }
  0x61   : > { %344 = vst [vmem:[#allocation4 + $0x60] sm:$0xff] %v2077_v1  ;;  %345 = vst [vmem:[#allocation4 + $0x70] sm:$0xff] %v2077_v1 }
  0x62   : > { %346 = vst [vmem:[#allocation4 + $0x78] sm:$0xff] %v2077_v1  ;;  %347 = vst [vmem:[#allocation4 + $0x28] sm:$0xff] %v2077_v1 }
  0x63 PF: > { %v349_v2 = vld [vmem:[%s2244_s5 + $0x8] sm:$0xff]  ;;  %v348_v3 = vld [vmem:[%s2244_s5] sm:$0xff]  ;;  %v2078_v4 = vmov 0   ;;  %v358_v7 = vld [vmem:[%s2244_s5 + $0x50] sm:$0xff]  ;;  %p1583_p9 = scmp.ne.s32.totalorder %s2054_s21, 2 }
  0x64   : > { %1823 = vset.pattern.permute.xlu1 %v2078_v4  ;;  %1822 = vset.pattern.permute.xlu0 %v2078_v4  ;;  %v357_v5 = vld [vmem:[%s2244_s5 + $0x48] sm:$0xff]  ;;  %v356_v6 = vld [vmem:[%s2244_s5 + $0x40] sm:$0xff]  ;;  %v350_v8 = vld [vmem:[%s2244_s5 + $0x10] sm:$0xff] }
  0x65   : > { %372 = vperm.xlu1 %1823, %v349_v2   ;;  %367 = vperm.xlu0 %1822, %v348_v3   ;;  %v359_v9 = vld [vmem:[%s2244_s5 + $0x58] sm:$0xff]  ;;  %v360_v11 = vld [vmem:[%s2244_s5 + $0x60] sm:$0xff]  ;;  %v361_v13 = vld [vmem:[%s2244_s5 + $0x68] sm:$0xff] }
  0x66   : > { %v351_v10 = vld [vmem:[%s2244_s5 + $0x18] sm:$0xff]  ;;  %v352_v12 = vld [vmem:[%s2244_s5 + $0x20] sm:$0xff]  ;;  %v353_v14 = vld [vmem:[%s2244_s5 + $0x28] sm:$0xff] }
  0x67   : > { %v362_v15 = vld [vmem:[%s2244_s5 + $0x70] sm:$0xff]  ;;  %v363_v17 = vld [vmem:[%s2244_s5 + $0x78] sm:$0xff]  ;;  %v515_v19 = vld [vmem:[%s2226_s27] sm:$0xf] }
  0x68   : > { %v354_v16 = vld [vmem:[%s2244_s5 + $0x30] sm:$0xff]  ;;  %v355_v18 = vld [vmem:[%s2244_s5 + $0x38] sm:$0xff]  ;;  %v516_v20 = vld [vmem:[%s2226_s27 + $0x4] sm:$0xf]  ;;  %vm531_vm1 = vcmp.gt.bf16.partialorder %v515_v19, 0 }
  0x69   : > { %412 = vperm.xlu1 %1823, %v357_v5   ;;  %407 = vperm.xlu0 %1822, %v356_v6   ;;  %v523_v21 = vld [vmem:[%s2226_s27 + $0x20] sm:$0xf]  ;;  %v524_v22 = vld [vmem:[%s2226_s27 + $0x24] sm:$0xf]  ;;  %vm532_vm2 = vcmp.gt.bf16.partialorder %v516_v20, 0  ;;  %v547_v23 = vsel %vm531_vm1, 65537, %v2078_v4 }
  0x6a   : > { %vm539_vm3 = vcmp.gt.bf16.partialorder %v523_v21, 0  ;;  %v517_v24 = vld [vmem:[%s2226_s27 + $0x8] sm:$0xf]  ;;  %vm540_vm4 = vcmp.gt.bf16.partialorder %v524_v22, 0  ;;  %v548_v25 = vsel %vm532_vm2, 65537, %v2078_v4  ;;  %v563_v29 = vunpack.c.l.b16 %v547_v23 }
  0x6b   : > { %v555_v26 = vsel %vm539_vm3, 65537, %v2078_v4  ;;  %v525_v27 = vld [vmem:[%s2226_s27 + $0x28] sm:$0xf]  ;;  %v518_v28 = vld [vmem:[%s2226_s27 + $0xc] sm:$0xf]  ;;  %vm533_vm5 = vcmp.gt.bf16.partialorder %v517_v24, 0  ;;  %v564_v32 = vunpack.c.l.b16 %v548_v25 }
  0x6c   : > { %v556_v30 = vsel %vm540_vm4, 65537, %v2078_v4  ;;  %v2324_v31 = vld [vmem:[%s283_s30] ss:$0 sm:$0xff]  ;;  %v571_v33 = vunpack.c.l.b16 %v555_v26  ;;  %vm541_vm6 = vcmp.gt.bf16.partialorder %v525_v27, 0  ;;  %vm534_vm7 = vcmp.gt.bf16.partialorder %v518_v28, 0 }
  0x6d   : > { %417 = vperm.xlu1 %1823, %v358_v7   ;;  %377 = vperm.xlu0 %1822, %v350_v8   ;;  %v549_v34 = vsel %vm533_vm5, 65537, %v2078_v4  ;;  %v526_v35 = vld [vmem:[%s2226_s27 + $0x2c] sm:$0xf]  ;;  %vm2328_vm8 = vcmp.ne.s32.totalorder %v563_v29, 0  ;;  %v572_v39 = vunpack.c.l.b16 %v556_v30  ;;  %v519_v40 = vld [vmem:[%s2226_s27 + $0x10] sm:$0xf] }
  0x6e   : > { %v557_v43 = vsel %vm541_vm6, 65537, %v2078_v4  ;;  %v550_v44 = vsel %vm534_vm7, 65537, %v2078_v4  ;;  %vm2337_vm9 = vcmp.ne.s32.totalorder %v564_v32, 0  ;;  %vm2341_vm10 = vcmp.ne.s32.totalorder %v571_v33, 0  ;;  %v527_v48 = vld [vmem:[%s2226_s27 + $0x30] sm:$0xf] }
  0x6f   : > { %v565_v47 = vunpack.c.l.b16 %v549_v34  ;;  %vm542_vm11 = vcmp.gt.bf16.partialorder %v526_v35, 0  ;;  %vm535_vm13 = vcmp.gt.bf16.partialorder %v519_v40, 0  ;;  %vm2346_vm15 = vcmp.ne.s32.totalorder %v572_v39, 0  ;;  %v520_v63 = vld [vmem:[%s2226_s27 + $0x14] sm:$0xf]  ;;  %v1075_v40 = vld [vmem:[%s2253_s2 + $0x78] sm:$0xff] }
  0x70   : > { %v573_v54 = vunpack.c.l.b16 %v557_v43  ;;  %v566_v55 = vunpack.c.l.b16 %v550_v44  ;;  %v558_v59 = vsel %vm542_vm11, 65537, %v2078_v4  ;;  %v551_v62 = vsel %vm535_vm13, 65537, %v2078_v4  ;;  %v529_v29 = vld [vmem:[%s2226_s27 + $0x38] sm:$0xf]  ;;  %v522_v34 = vld [vmem:[%s2226_s27 + $0x1c] sm:$0xf]  ;;  %1622 = vmatprep.subr.mxu0 %v1075_v40  ;;  %1678 = vmatprep.subr.mxu1 %v1075_v40 }
  0x71   : > { %422 = vperm.xlu1 %1823, %v359_v9   ;;  %382 = vperm.xlu0 %1822, %v351_v10   ;;  %vm2357_vm0 = vcmp.ne.s32.totalorder %v565_v47, 0  ;;  %vm543_vm1 = vcmp.gt.bf16.partialorder %v527_v48, 0  ;;  %v574_v8 = vunpack.c.l.b16 %v558_v59  ;;  %vm536_vm6 = vcmp.gt.bf16.partialorder %v520_v63, 0 }
  0x72   : > { %vm2365_vm4 = vcmp.ne.s32.totalorder %v573_v54, 0  ;;  %vm2369_vm5 = vcmp.ne.s32.totalorder %v566_v55, 0  ;;  %v552_v28 = vsel %vm536_vm6, 65537, %v2078_v4  ;;  %1623 = vmatpush3.msra.mxu0 %v1075_v40  ;;  %1694 = vmatpush3.msra.mxu1 %v1075_v40 }
  0x75   : > { %427 = vperm.xlu1 %1823, %v360_v11   ;;  %387 = vperm.xlu0 %1822, %v352_v12   ;;  %v559_v12 = vsel %vm543_vm1, 65537, %v2078_v4  ;;  %vm538_vm1 = vcmp.gt.bf16.partialorder %v522_v34, 0 }
  0x76   : > { %v575_v24 = vunpack.c.l.b16 %v559_v12 }
  0x79   : > { %432 = vperm.xlu1 %1823, %v361_v13   ;;  %392 = vperm.xlu0 %1822, %v353_v14   ;;  %v528_v13 = vld [vmem:[%s2226_s27 + $0x34] sm:$0xf] }
  0x7d   : > { %437 = vperm.xlu1 %1823, %v362_v15   ;;  %397 = vperm.xlu0 %1822, %v354_v16   ;;  %v567_v16 = vunpack.c.l.b16 %v551_v62 }
  0x7f   : > { %vm2407_vm11 = vcmp.ne.s32.totalorder %v567_v16, 0 }
  0x81   : > { %442 = vperm.xlu1 %1823, %v363_v17   ;;  %402 = vperm.xlu0 %1822, %v355_v18   ;;  %v521_v17 = vld [vmem:[%s2226_s27 + $0x18] sm:$0xf] }
  0xe0   : > { %v373_v36 = vpop.permute.xlu1 %372  ;;  %v368_v37 = vpop.permute.xlu0 %367 }
  0xe1   : > { %v452_v41 = vadd.f32 %v2324_v31, %v373_v36  ;;  %v451_v42 = vadd.f32 %v2324_v31, %v368_v37 }
  0xe3   : > { %v484_v49 = vmul.f32 0.2, %v452_v41  ;;  %v483_v50 = vmul.f32 0.2, %v451_v42  ;;  %vm467_vm12 = vcmp.gt.f32.partialorder %v451_v42, 0.0  ;;  %vm468_vm14 = vcmp.gt.f32.partialorder %v452_v41, 0.0 }
  0xe4   : > { %v413_v51 = vpop.permute.xlu1 %412  ;;  %v408_v52 = vpop.permute.xlu0 %407 }
  0xe5   : > { %v460_v56 = vadd.f32 %v2324_v31, %v413_v51  ;;  %v459_v57 = vadd.f32 %v2324_v31, %v408_v52  ;;  %v499_v58 = vsel %vm467_vm12, %v451_v42, %v483_v50  ;;  %v500_v2 = vsel %vm468_vm14, %v452_v41, %v484_v49  ;;  %v530_v49 = vld [vmem:[%s2226_s27 + $0x3c] sm:$0xf] }
  0xe6   : > { %v2355_v60 = vsel %vm2328_vm8, %v499_v58, 0.0  ;;  %v2380_v14 = vsel %vm2337_vm9, %v500_v2, 0.0  ;;  %vm2390_vm9 = vcmp.ne.s32.totalorder %v574_v8, 0  ;;  %vm537_vm12 = vcmp.gt.bf16.partialorder %v521_v17, 0  ;;  %v2542_v8 = vld [vmem:[#allocation2 + $0x18] sm:$0xff] }
  0xe7   : > { %v492_v0 = vmul.f32 0.2, %v460_v56  ;;  %v491_v1 = vmul.f32 0.2, %v459_v57  ;;  %627 = vmax.xlane.f32.xlu0 %v2355_v60  ;;  %vm475_vm2 = vcmp.gt.f32.partialorder %v459_v57, 0.0  ;;  %vm476_vm3 = vcmp.gt.f32.partialorder %v460_v56, 0.0 }
  0xe8   : > { %v418_v3 = vpop.permute.xlu1 %417  ;;  %v378_v5 = vpop.permute.xlu0 %377  ;;  %v568_v41 = vunpack.c.l.b16 %v552_v28  ;;  %v553_v48 = vsel %vm537_vm12, 65537, %v2078_v4 }
  0xe9   : > { %v461_v9 = vadd.f32 %v2324_v31, %v418_v3  ;;  %v453_v10 = vadd.f32 %v2324_v31, %v378_v5  ;;  %v507_v11 = vsel %vm475_vm2, %v459_v57, %v491_v1  ;;  %v508_v20 = vsel %vm476_vm3, %v460_v56, %v492_v0 }
  0xea   : > { %v2384_v15 = vsel %vm2341_vm10, %v507_v11, 0.0  ;;  %vm544_vm10 = vcmp.gt.bf16.partialorder %v528_v13, 0  ;;  %v2401_v30 = vsel %vm2346_vm15, %v508_v20, 0.0  ;;  %vm2415_vm15 = vcmp.ne.s32.totalorder %v575_v24, 0 }
  0xeb   : > { %v493_v18 = vmul.f32 0.2, %v461_v9  ;;  %v485_v19 = vmul.f32 0.2, %v453_v10  ;;  %629 = vmax.xlane.f32.xlu0 %v2380_v14  ;;  %643 = vmax.xlane.f32.xlu1 %v2384_v15  ;;  %vm469_vm7 = vcmp.gt.f32.partialorder %v453_v10, 0.0  ;;  %vm477_vm8 = vcmp.gt.f32.partialorder %v461_v9, 0.0 }
  0xec   : > { %v423_v21 = vpop.permute.xlu1 %422  ;;  %v383_v22 = vpop.permute.xlu0 %382  ;;  %v560_v42 = vsel %vm544_vm10, 65537, %v2078_v4  ;;  %v569_v62 = vunpack.c.l.b16 %v553_v48  ;;  %v554_v1 = vsel %vm538_vm1, 65537, %v2078_v4  ;;  %v1070_v48 = vld [vmem:[%s2253_s2 + $0x50] sm:$0xff]  ;;  %vm931_vm1 = vcmask 7168  }
  0xed   : > { %v462_v25 = vadd.f32 %v2324_v31, %v423_v21  ;;  %v454_v26 = vadd.f32 %v2324_v31, %v383_v22  ;;  %v501_v27 = vsel %vm469_vm7, %v453_v10, %v485_v19  ;;  %v509_v37 = vsel %vm477_vm8, %v461_v9, %v493_v18 }
  0xee   : > { %v2405_v32 = vsel %vm2357_vm0, %v501_v27, 0.0  ;;  %vm545_vm0 = vcmp.gt.bf16.partialorder %v529_v29, 0  ;;  %v2425_v46 = vsel %vm2365_vm4, %v509_v37, 0.0  ;;  %vm2437_vm4 = vcmp.ne.s32.totalorder %v568_v41, 0  ;;  %v1074_v41 = vld [vmem:[%s2253_s2 + $0x70] sm:$0xff] }
  0xef   : > { %v494_v35 = vmul.f32 0.2, %v462_v25  ;;  %v486_v36 = vmul.f32 0.2, %v454_v26  ;;  %645 = vmax.xlane.f32.xlu0 %v2401_v30  ;;  %631 = vmax.xlane.f32.xlu1 %v2405_v32  ;;  %vm470_vm13 = vcmp.gt.f32.partialorder %v454_v26, 0.0  ;;  %vm478_vm14 = vcmp.gt.f32.partialorder %v462_v25, 0.0 }
  0xf0   : > { %v428_v38 = vpop.permute.xlu1 %427  ;;  %v388_v39 = vpop.permute.xlu0 %387  ;;  %v576_v56 = vunpack.c.l.b16 %v560_v42  ;;  %v561_v57 = vsel %vm545_vm0, 65537, %v2078_v4  ;;  %v570_v18 = vunpack.c.l.b16 %v554_v1  ;;  %v1073_v42 = vld [vmem:[%s2253_s2 + $0x68] sm:$0xff]  ;;  %1624 = vmatprep.subr.mxu0 %v1074_v41  ;;  %1679 = vmatprep.subr.mxu1 %v1074_v41  ;;  %v1066_v1 = vld [vmem:[%s2253_s2 + $0x30] sm:$0xff] }
  0xf1   : > { %v463_v43 = vadd.f32 %v2324_v31, %v428_v38  ;;  %v455_v44 = vadd.f32 %v2324_v31, %v388_v39  ;;  %v502_v45 = vsel %vm470_vm13, %v454_v26, %v486_v36  ;;  %v510_v52 = vsel %vm478_vm14, %v462_v25, %v494_v35  ;;  %1625 = vmatpush3.msra.mxu0 %v1074_v41 }
  0xf2   : > { %v2429_v47 = vsel %vm2369_vm5, %v502_v45, 0.0  ;;  %v2447_v63 = vsel %vm2390_vm9, %v510_v52, 0.0  ;;  %vm546_vm5 = vcmp.gt.bf16.partialorder %v530_v49, 0  ;;  %vm2458_vm8 = vcmp.ne.s32.totalorder %v576_v56, 0  ;;  %1695 = vmatpush3.msra.mxu1 %v1074_v41  ;;  %1626 = vmatprep.subr.mxu0 %v1073_v42  ;;  %v2506_v45 = vld [vmem:[#allocation2] sm:$0xff] }
  0xf3   : > { %v495_v50 = vmul.f32 0.2, %v463_v43  ;;  %v487_v51 = vmul.f32 0.2, %v455_v44  ;;  %647 = vmax.xlane.f32.xlu0 %v2425_v46  ;;  %633 = vmax.xlane.f32.xlu1 %v2429_v47  ;;  %vm471_vm2 = vcmp.gt.f32.partialorder %v455_v44, 0.0  ;;  %vm479_vm3 = vcmp.gt.f32.partialorder %v463_v43, 0.0 }
  0xf4   : > { %v433_v53 = vpop.permute.xlu1 %432  ;;  %v393_v54 = vpop.permute.xlu0 %392  ;;  %v577_v9 = vunpack.c.l.b16 %v561_v57  ;;  %vm2464_vm9 = vcmp.ne.s32.totalorder %v569_v62, 0  ;;  %v562_v19 = vsel %vm546_vm5, 65537, %v2078_v4  ;;  %vm586_vm13 = vcmp.ne.s32.totalorder %v570_v18, 0  ;;  %1680 = vmatprep.subr.mxu1 %v1073_v42  ;;  %1627 = vmatpush3.msra.mxu0 %v1073_v42  ;;  %v2513_v52 = vld [vmem:[#allocation2 + $0x40] sm:$0xff]  ;;  %v2528_v62 = vld [vmem:[#allocation2 + $0x48] sm:$0xff] }
  0xf5   : > { %v464_v58 = vadd.f32 %v2324_v31, %v433_v53  ;;  %v456_v59 = vadd.f32 %v2324_v31, %v393_v54  ;;  %v503_v61 = vsel %vm471_vm2, %v455_v44, %v487_v51  ;;  %v511_v5 = vsel %vm479_vm3, %v463_v43, %v495_v50  ;;  %v1072_v43 = vld [vmem:[%s2253_s2 + $0x60] sm:$0xff]  ;;  %v1071_v44 = vld [vmem:[%s2253_s2 + $0x58] sm:$0xff]  ;;  %1696 = vmatpush3.msra.mxu1 %v1073_v42  ;;  %v1069_v51 = vld [vmem:[%s2253_s2 + $0x48] sm:$0xff] }
  0xf6   : > { %v2451_v0 = vsel %vm2407_vm11, %v503_v61, 0.0  ;;  %v2470_v16 = vsel %vm2415_vm15, %v511_v5, 0.0  ;;  %vm593_vm12 = vcmp.ne.s32.totalorder %v577_v9, 0  ;;  %v578_v29 = vunpack.c.l.b16 %v562_v19  ;;  %1628 = vmatprep.subr.mxu0 %v1072_v43  ;;  %1681 = vmatprep.subr.mxu1 %v1072_v43  ;;  %v2515_v53 = vld [vmem:[#allocation2 + $0x8] sm:$0xff]  ;;  %v1068_v54 = vld [vmem:[%s2253_s2 + $0x40] sm:$0xff]  ;;  %v2526_v61 = vld [vmem:[#allocation2 + $0x10] sm:$0xff] }
  0xf7   : > { %v496_v2 = vmul.f32 0.2, %v464_v58  ;;  %v488_v3 = vmul.f32 0.2, %v456_v59  ;;  %649 = vmax.xlane.f32.xlu0 %v2447_v63  ;;  %635 = vmax.xlane.f32.xlu1 %v2451_v0  ;;  %vm472_vm6 = vcmp.gt.f32.partialorder %v456_v59, 0.0  ;;  %vm480_vm7 = vcmp.gt.f32.partialorder %v464_v58, 0.0 }
  0xf8   : > { %v438_v6 = vpop.permute.xlu1 %437  ;;  %v398_v7 = vpop.permute.xlu0 %397  ;;  %vm594_vm0 = vcmp.ne.s32.totalorder %v578_v29, 0  ;;  %1629 = vmatpush3.msra.mxu0 %v1072_v43  ;;  %1697 = vmatpush3.msra.mxu1 %v1072_v43  ;;  %v2544_v9 = vld [vmem:[#allocation2 + $0x50] sm:$0xff] }
  0xf9   : > { %v465_v10 = vadd.f32 %v2324_v31, %v438_v6  ;;  %v457_v11 = vadd.f32 %v2324_v31, %v398_v7  ;;  %v504_v12 = vsel %vm472_vm6, %v456_v59, %v488_v3  ;;  %v512_v22 = vsel %vm480_vm7, %v464_v58, %v496_v2  ;;  %1630 = vmatprep.subr.mxu0 %v1071_v44  ;;  %v1067_v59 = vld [vmem:[%s2253_s2 + $0x38] sm:$0xff]  ;;  %v1065_v7 = vld [vmem:[%s2253_s2 + $0x28] sm:$0xff] }
  0xfa   : > { %v2474_v17 = vsel %vm2437_vm4, %v504_v12, 0.0  ;;  %v2484_v4 = vsel %vm2458_vm8, %v512_v22, 0.0  ;;  %1682 = vmatprep.subr.mxu1 %v1071_v44  ;;  %1631 = vmatpush3.msra.mxu0 %v1071_v44  ;;  %v1063_v22 = vld [vmem:[%s2253_s2 + $0x18] sm:$0xff] }
  0xfb   : > { %v497_v20 = vmul.f32 0.2, %v465_v10  ;;  %v489_v21 = vmul.f32 0.2, %v457_v11  ;;  %651 = vmax.xlane.f32.xlu0 %v2470_v16  ;;  %637 = vmax.xlane.f32.xlu1 %v2474_v17  ;;  %vm473_vm10 = vcmp.gt.f32.partialorder %v457_v11, 0.0  ;;  %vm481_vm11 = vcmp.gt.f32.partialorder %v465_v10, 0.0 }
  0xfc   : > { %v443_v23 = vpop.permute.xlu1 %442  ;;  %v403_v24 = vpop.permute.xlu0 %402  ;;  %1698 = vmatpush3.msra.mxu1 %v1071_v44  ;;  %1632 = vmatprep.subr.mxu0 %v1070_v48 }
  0xfd   : > { %v466_v25 = vadd.f32 %v2324_v31, %v443_v23  ;;  %v458_v26 = vadd.f32 %v2324_v31, %v403_v24  ;;  %v505_v27 = vsel %vm473_vm10, %v457_v11, %v489_v21  ;;  %v513_v31 = vsel %vm481_vm11, %v465_v10, %v497_v20  ;;  %1683 = vmatprep.subr.mxu1 %v1070_v48  ;;  %v1064_v10 = vld [vmem:[%s2253_s2 + $0x20] sm:$0xff]  ;;  %v2560_v21 = vld [vmem:[#allocation2 + $0x58] sm:$0xff] }
  0xfe   : > { %v2488_v28 = vsel %vm2464_vm9, %v505_v27, 0.0  ;;  %v2492_v36 = vsel %vm593_vm12, %v513_v31, 0.0  ;;  %1633 = vmatpush3.msra.mxu0 %v1070_v48  ;;  %1699 = vmatpush3.msra.mxu1 %v1070_v48  ;;  %v615_v20 = vld [vmem:[#allocation2 + $0x20] sm:$0xff] }
  0xff   : > { %v498_v33 = vmul.f32 0.2, %v466_v25  ;;  %v490_v34 = vmul.f32 0.2, %v458_v26  ;;  %653 = vmax.xlane.f32.xlu0 %v2484_v4  ;;  %639 = vmax.xlane.f32.xlu1 %v2488_v28  ;;  %vm474_vm14 = vcmp.gt.f32.partialorder %v458_v26, 0.0  ;;  %vm482_vm15 = vcmp.gt.f32.partialorder %v466_v25, 0.0 }
 0x100   : > { %1634 = vmatprep.subr.mxu0 %v1069_v51  ;;  %1684 = vmatprep.subr.mxu1 %v1069_v51  ;;  %v2577_v31 = vld [vmem:[#allocation2 + $0x60] sm:$0xff] }
 0x101   : > { %v506_v35 = vsel %vm474_vm14, %v458_v26, %v490_v34  ;;  %v514_v38 = vsel %vm482_vm15, %v466_v25, %v498_v33  ;;  %1635 = vmatpush3.msra.mxu0 %v1069_v51  ;;  %1700 = vmatpush3.msra.mxu1 %v1069_v51  ;;  %v1062_v33 = vld [vmem:[%s2253_s2 + $0x10] sm:$0xff]  ;;  %v2575_v34 = vld [vmem:[#allocation2 + $0x28] sm:$0xff]  ;;  %v1060_v51 = vld [vmem:[%s2253_s2] sm:$0xff] }
 0x102   : > { %v2494_v37 = vsel %vm586_vm13, %v506_v35, 0.0  ;;  %v2498_v39 = vsel %vm594_vm0, %v514_v38, 0.0  ;;  %1636 = vmatprep.subr.mxu0 %v1068_v54  ;;  %1685 = vmatprep.subr.mxu1 %v1068_v54  ;;  %v1061_v38 = vld [vmem:[%s2253_s2 + $0x8] sm:$0xff] }
 0x103   : > { %655 = vmax.xlane.f32.xlu0 %v2492_v36  ;;  %641 = vmax.xlane.f32.xlu1 %v2494_v37 }
 0x104   : > { %1637 = vmatpush3.msra.mxu0 %v1068_v54  ;;  %1701 = vmatpush3.msra.mxu1 %v1068_v54 }
 0x105   : > { %1638 = vmatprep.subr.mxu0 %v1067_v59  ;;  %1686 = vmatprep.subr.mxu1 %v1067_v59 }
 0x106   : > { %1639 = vmatpush3.msra.mxu0 %v1067_v59  ;;  %1702 = vmatpush3.msra.mxu1 %v1067_v59 }
 0x107   : > { %657 = vmax.xlane.f32.xlu0 %v2498_v39  ;;  %1640 = vmatprep.subr.mxu0 %v1066_v1 }
 0x108   : > { %1641 = vmatpush3.msra.mxu0 %v1066_v1  ;;  %1687 = vmatprep.subr.mxu1 %v1066_v1 }
 0x109   : > { %1642 = vmatprep.subr.mxu0 %v1065_v7  ;;  %1703 = vmatpush3.msra.mxu1 %v1066_v1  ;;  %v2602_v1 = vld [vmem:[#allocation2 + $0x70] sm:$0xff] }
 0x10a   : > { %1643 = vmatpush3.msra.mxu0 %v1065_v7  ;;  %1688 = vmatprep.subr.mxu1 %v1065_v7 }
 0x10b   : > { %1644 = vmatprep.subr.mxu0 %v1064_v10  ;;  %1704 = vmatpush3.msra.mxu1 %v1065_v7 }
 0x10c   : > { %1645 = vmatpush3.msra.mxu0 %v1064_v10  ;;  %1689 = vmatprep.subr.mxu1 %v1064_v10 }
 0x10d   : > { %1646 = vmatprep.subr.mxu0 %v1063_v22  ;;  %1705 = vmatpush3.msra.mxu1 %v1064_v10 }
 0x10e   : > { %1647 = vmatpush3.msra.mxu0 %v1063_v22  ;;  %1690 = vmatprep.subr.mxu1 %v1063_v22 }
 0x10f   : > { %1648 = vmatprep.subr.mxu0 %v1062_v33  ;;  %1706 = vmatpush3.msra.mxu1 %v1063_v22 }
 0x110   : > { %1649 = vmatpush3.msra.mxu0 %v1062_v33  ;;  %1691 = vmatprep.subr.mxu1 %v1062_v33 }
 0x111   : > { %1650 = vmatprep.subr.mxu0 %v1061_v38  ;;  %1707 = vmatpush3.msra.mxu1 %v1062_v33 }
 0x112   : > { %1651 = vmatpush3.msra.mxu0 %v1061_v38  ;;  %1692 = vmatprep.subr.mxu1 %v1061_v38 }
 0x113   : > { %1652 = vmatprep.subr.mxu0 %v1060_v51  ;;  %1708 = vmatpush3.msra.mxu1 %v1061_v38 }
 0x114   : > { %1653 = vmatpush3.msra.mxu0 %v1060_v51  ;;  %1693 = vmatprep.subr.mxu1 %v1060_v51 }
 0x115   : > { %1709 = vmatpush3.msra.mxu1 %v1060_v51 }
 0x170   : > { %v628_v49 = vpop.xlane.xlu0 %627 }
 0x171   : > { %v2510_v50 = vmax.f32 %v2506_v45, %v628_v49  ;;  %v617_v49 = vld [vmem:[#allocation2 + $0x30] sm:$0xff] }
 0x173   : > { %1253 = vst.msk [vmem:[#allocation2] sm:$0xff] %vm931_vm1, %v2510_v50  ;;  %725 = vperm.xlu1 %1823, %v2510_v50   ;;  %v675_v23 = vsub.f32 %v2506_v45, %v2510_v50  ;;  %v2590_v50 = vld [vmem:[#allocation2 + $0x68] sm:$0xff] }
 0x174   : > { %v644_v55 = vpop.xlane.xlu1 %643  ;;  %v630_v56 = vpop.xlane.xlu0 %629 }
 0x175   : > { %v2522_v57 = vmax.f32 %v2513_v52, %v644_v55  ;;  %v660_v58 = vmax.f32 %v2515_v53, %v630_v56  ;;  %v691_v40 = vmul.f32 1.442695, %v675_v23 }
 0x177   : > { %1261 = vst.msk [vmem:[#allocation2 + $0x40] sm:$0xff] %vm931_vm1, %v2522_v57  ;;  %1254 = vst.msk [vmem:[#allocation2 + $0x8] sm:$0xff] %vm931_vm1, %v660_v58  ;;  %765 = vperm.xlu0 %1822, %v2522_v57   ;;  %730 = vperm.xlu1 %1823, %v660_v58   ;;  %v676_v13 = vsub.f32 %v2515_v53, %v660_v58 }
 0x178   : > { %v632_v2 = vpop.xlane.xlu1 %631  ;;  %v646_v3 = vpop.xlane.xlu0 %645 }
 0x179   : > { %v2536_v5 = vmax.f32 %v2526_v61, %v632_v2  ;;  %v2539_v6 = vmax.f32 %v2528_v62, %v646_v3  ;;  %v693_v26 = vmul.f32 1.442695, %v676_v13  ;;  %v683_v2 = vsub.f32 %v2513_v52, %v2522_v57  ;;  %v2614_v57 = vld [vmem:[#allocation2 + $0x78] sm:$0xff] }
 0x17b   : > { %1255 = vst.msk [vmem:[#allocation2 + $0x10] sm:$0xff] %vm931_vm1, %v2536_v5  ;;  %1262 = vst.msk [vmem:[#allocation2 + $0x48] sm:$0xff] %vm931_vm1, %v2539_v6  ;;  %735 = vperm.xlu0 %1822, %v2536_v5   ;;  %770 = vperm.xlu1 %1823, %v2539_v6   ;;  %v677_v41 = vsub.f32 %v2526_v61, %v2536_v5  ;;  %1824 = vpow2.f32 %v693_v26  ;;  %v618_v61 = vld [vmem:[#allocation2 + $0x38] sm:$0xff]  ;;  %v707_v13 = vmul.f32 1.442695, %v683_v2 }
 0x17c   : > { %v634_v11 = vpop.xlane.xlu1 %633  ;;  %v648_v12 = vpop.xlane.xlu0 %647  ;;  %1826 = vpow2.f32 %v691_v40 }
 0x17d   : > { %v2555_v18 = vmax.f32 %v2542_v8, %v634_v11  ;;  %v2558_v19 = vmax.f32 %v2544_v9, %v648_v12  ;;  %v695_v53 = vmul.f32 1.442695, %v677_v41 }
 0x17f   : > { %1256 = vst.msk [vmem:[#allocation2 + $0x18] sm:$0xff] %vm931_vm1, %v2555_v18  ;;  %1263 = vst.msk [vmem:[#allocation2 + $0x50] sm:$0xff] %vm931_vm1, %v2558_v19  ;;  %740 = vperm.xlu0 %1822, %v2555_v18   ;;  %775 = vperm.xlu1 %1823, %v2558_v19   ;;  %v678_v54 = vsub.f32 %v2542_v8, %v2555_v18  ;;  %v685_v18 = vsub.f32 %v2544_v9, %v2558_v19 }
 0x180   : > { %v636_v24 = vpop.xlane.xlu1 %635  ;;  %v650_v25 = vpop.xlane.xlu0 %649 }
 0x181   : > { %v663_v27 = vmax.f32 %v615_v20, %v636_v24  ;;  %v2572_v29 = vmax.f32 %v2560_v21, %v650_v25  ;;  %v697_v5 = vmul.f32 1.442695, %v678_v54  ;;  %v711_v19 = vmul.f32 1.442695, %v685_v18 }
 0x183   : > { %v679_v35 = vsub.f32 %v615_v20, %v663_v27  ;;  %1257 = vst.msk [vmem:[#allocation2 + $0x20] sm:$0xff] %vm931_vm1, %v663_v27  ;;  %1264 = vst.msk [vmem:[#allocation2 + $0x58] sm:$0xff] %vm931_vm1, %v2572_v29  ;;  %745 = vperm.xlu0 %1822, %v663_v27   ;;  %780 = vperm.xlu1 %1823, %v2572_v29  }
 0x184   : > { %v638_v42 = vpop.xlane.xlu1 %637  ;;  %v652_v43 = vpop.xlane.xlu0 %651 }
 0x185   : > { %v699_v44 = vmul.f32 1.442695, %v679_v35  ;;  %v664_v45 = vmax.f32 %v2575_v34, %v638_v42  ;;  %v2588_v48 = vmax.f32 %v2577_v31, %v652_v43  ;;  %v686_v42 = vsub.f32 %v2560_v21, %v2572_v29 }
 0x187   : > { %1258 = vst.msk [vmem:[#allocation2 + $0x28] sm:$0xff] %vm931_vm1, %v664_v45  ;;  %1265 = vst.msk [vmem:[#allocation2 + $0x60] sm:$0xff] %vm931_vm1, %v2588_v48  ;;  %750 = vperm.xlu0 %1822, %v664_v45   ;;  %785 = vperm.xlu1 %1823, %v2588_v48   ;;  %1828 = vpow2.f32 %v699_v44  ;;  %v680_v10 = vsub.f32 %v2575_v34, %v664_v45  ;;  %v687_v26 = vsub.f32 %v2577_v31, %v2588_v48 }
 0x188   : > { %v640_v55 = vpop.xlane.xlu1 %639  ;;  %v654_v56 = vpop.xlane.xlu0 %653  ;;  %1830 = vpow2.f32 %v695_v53  ;;  %v684_v34 = vsub.f32 %v2528_v62, %v2539_v6  ;;  %v713_v6 = vmul.f32 1.442695, %v686_v42 }
 0x189   : > { %v665_v58 = vmax.f32 %v617_v49, %v640_v55  ;;  %v2600_v59 = vmax.f32 %v2590_v50, %v654_v56  ;;  %v701_v23 = vmul.f32 1.442695, %v680_v10  ;;  %v2627_v9 = vpop.eup %1824  ;;  %v715_v31 = vmul.f32 1.442695, %v687_v26 }
 0x18a   : > { %v2637_v33 = vpop.eup %1826  ;;  %v709_v41 = vmul.f32 1.442695, %v684_v34 }
 0x18b   : > { %v681_v3 = vsub.f32 %v617_v49, %v665_v58  ;;  %1259 = vst.msk [vmem:[#allocation2 + $0x30] sm:$0xff] %vm931_vm1, %v665_v58  ;;  %1266 = vst.msk [vmem:[#allocation2 + $0x68] sm:$0xff] %vm931_vm1, %v2600_v59  ;;  %755 = vperm.xlu0 %1822, %v665_v58   ;;  %790 = vperm.xlu1 %1823, %v2600_v59   ;;  %v688_v43 = vsub.f32 %v2590_v50, %v2600_v59 }
 0x18c   : > { %v642_v7 = vpop.xlane.xlu1 %641  ;;  %v656_v8 = vpop.xlane.xlu0 %655 }
 0x18d   : > { %v703_v11 = vmul.f32 1.442695, %v681_v3  ;;  %v666_v12 = vmax.f32 %v618_v61, %v642_v7  ;;  %v2612_v52 = vmax.f32 %v2602_v1, %v656_v8  ;;  %v717_v21 = vmul.f32 1.442695, %v688_v43 }
 0x18f   : > { %1832 = vpow2.f32 %v703_v11  ;;  %1260 = vst.msk [vmem:[#allocation2 + $0x38] sm:$0xff] %vm931_vm1, %v666_v12  ;;  %v689_v20 = vsub.f32 %v2602_v1, %v2612_v52  ;;  %1267 = vst.msk [vmem:[#allocation2 + $0x70] sm:$0xff] %vm931_vm1, %v2612_v52  ;;  %760 = vperm.xlu0 %1822, %v666_v12   ;;  %795 = vperm.xlu1 %1823, %v2612_v52   ;;  %v682_v24 = vsub.f32 %v618_v61, %v666_v12 }
 0x190   : > { %v658_v22 = vpop.xlane.xlu0 %657  ;;  %1834 = vpow2.f32 %v697_v5 }
 0x191   : > { %v2625_v25 = vmax.f32 %v2614_v57, %v658_v22  ;;  %1836 = vpow2.f32 %v707_v13  ;;  %v705_v35 = vmul.f32 1.442695, %v682_v24 }
 0x192   : > { %1838 = vpow2.f32 %v701_v23 }
 0x193   : > { %v690_v27 = vsub.f32 %v2614_v57, %v2625_v25  ;;  %1268 = vst.msk [vmem:[#allocation2 + $0x78] sm:$0xff] %vm931_vm1, %v2625_v25  ;;  %971 = vperm.xlu0 %1822, %v2627_v9   ;;  %800 = vperm.xlu1 %1823, %v2625_v25   ;;  %1840 = vpow2.f32 %v711_v19 }
 0x194   : > { %v2641_v38 = vpop.eup %1828  ;;  %1842 = vpow2.f32 %v705_v35 }
 0x195   : > { %v2645_v40 = vpop.eup %1830  ;;  %1844 = vpow2.f32 %v715_v31 }
 0x196   : > { %1846 = vpow2.f32 %v709_v41 }
 0x197   : > { %986 = vperm.xlu0 %1822, %v2641_v38   ;;  %966 = vperm.xlu1 %1823, %v2637_v33   ;;  %1848 = vpow2.f32 %v713_v6 }
 0x198   : > { %1850 = vpow2.f32 %v717_v21 }
 0x19b   : > { %976 = vperm.xlu1 %1823, %v2645_v40  }
 0x19c   : > { %v2650_v62 = vpop.eup %1832 }
 0x19d   : > { %996 = vperm.xlu0 %1822, %v2650_v62   ;;  %v2655_v44 = vpop.eup %1834 }
 0x19e   : > { %v2658_v45 = vpop.eup %1836 }
 0x19f   : > { %981 = vperm.xlu1 %1823, %v2655_v44   ;;  %v2661_v29 = vpop.eup %1838 }
 0x1a0   : > { %v2664_v48 = vpop.eup %1840 }
 0x1a1   : > { %1006 = vperm.xlu0 %1822, %v2658_v45   ;;  %v2667_v49 = vpop.eup %1842 }
 0x1a2   : > { %v2670_v50 = vpop.eup %1844 }
 0x1a3   : > { %991 = vperm.xlu1 %1823, %v2661_v29   ;;  %v2673_v51 = vpop.eup %1846 }
 0x1a4   : > { %v2676_v53 = vpop.eup %1848 }
 0x1a5   : > { %1016 = vperm.xlu0 %1822, %v2664_v48   ;;  %v2679_v54 = vpop.eup %1850 }
 0x1a7   : > { %1001 = vperm.xlu1 %1823, %v2667_v49  }
 0x1a9   : > { %1026 = vperm.xlu0 %1822, %v2670_v50  }
 0x1ab   : > { %1011 = vperm.xlu1 %1823, %v2673_v51  }
 0x1af   : > { %1021 = vperm.xlu1 %1823, %v2676_v53  }
 0x1b3   : > { %1031 = vperm.xlu1 %1823, %v2679_v54  }
 0x1ee   : > { %v726_v55 = vpop.permute.xlu1 %725 }
 0x1ef   : > { %v803_v56 = vsub.f32 %v2355_v60, %v726_v55 }
 0x1f1   : > { %v819_v58 = vmul.f32 1.442695, %v803_v56 }
 0x1f2   : > { %v731_v59 = vpop.permute.xlu1 %730  ;;  %v766_v61 = vpop.permute.xlu0 %765 }
 0x1f3   : > { %1852 = vpow2.f32 %v819_v58  ;;  %v804_v2 = vsub.f32 %v2380_v14, %v731_v59  ;;  %v811_v3 = vsub.f32 %v2384_v15, %v766_v61 }
 0x1f5   : > { %v821_v5 = vmul.f32 1.442695, %v804_v2  ;;  %v835_v7 = vmul.f32 1.442695, %v811_v3 }
 0x1f6   : > { %v771_v8 = vpop.permute.xlu1 %770  ;;  %v736_v10 = vpop.permute.xlu0 %735 }
 0x1f7   : > { %1854 = vpow2.f32 %v821_v5  ;;  %v812_v11 = vsub.f32 %v2401_v30, %v771_v8  ;;  %v805_v12 = vsub.f32 %v2405_v32, %v736_v10 }
 0x1f8   : > { %1856 = vpow2.f32 %v835_v7 }
 0x1f9   : > { %v837_v13 = vmul.f32 1.442695, %v812_v11  ;;  %v823_v60 = vmul.f32 1.442695, %v805_v12 }
 0x1fa   : > { %v776_v18 = vpop.permute.xlu1 %775  ;;  %v741_v22 = vpop.permute.xlu0 %740 }
 0x1fb   : > { %1858 = vpow2.f32 %v837_v13  ;;  %v813_v23 = vsub.f32 %v2425_v46, %v776_v18  ;;  %v806_v14 = vsub.f32 %v2429_v47, %v741_v22 }
 0x1fc   : > { %1860 = vpow2.f32 %v823_v60 }
 0x1fd   : > { %v839_v15 = vmul.f32 1.442695, %v813_v23  ;;  %v825_v24 = vmul.f32 1.442695, %v806_v14 }
 0x1fe   : > { %v781_v19 = vpop.permute.xlu1 %780  ;;  %v746_v26 = vpop.permute.xlu0 %745 }
 0x1ff   : > { %1862 = vpow2.f32 %v839_v15  ;;  %v814_v30 = vsub.f32 %v2447_v63, %v781_v19  ;;  %v807_v32 = vsub.f32 %v2451_v0, %v746_v26  ;;  %v719_v19 = vmul.f32 1.442695, %v689_v20 }
 0x200   : > { %v1853_v34 = vpop.eup %1852  ;;  %1864 = vpow2.f32 %v825_v24  ;;  %v721_v24 = vmul.f32 1.442695, %v690_v27 }
 0x201   : > { %v841_v35 = vmul.f32 1.442695, %v814_v30  ;;  %v827_v31 = vmul.f32 1.442695, %v807_v32  ;;  %1654 = vmatprep.mubr.f32.mxu0 %v1853_v34  ;;  %883 = vadd.xlane.f32.xlu0 %v1853_v34 }
 0x202   : > { %v786_v41 = vpop.permute.xlu1 %785  ;;  %v751_v46 = vpop.permute.xlu0 %750 }
 0x203   : > { %1866 = vpow2.f32 %v841_v35  ;;  %v815_v47 = vsub.f32 %v2470_v16, %v786_v41  ;;  %v808_v42 = vsub.f32 %v2474_v17, %v751_v46 }
 0x204   : > { %v1855_v6 = vpop.eup %1854  ;;  %1868 = vpow2.f32 %v827_v31 }
 0x205   : > { %v1857_v43 = vpop.eup %1856  ;;  %v843_v21 = vmul.f32 1.442695, %v815_v47  ;;  %v829_v63 = vmul.f32 1.442695, %v808_v42  ;;  %1655 = vmatmul.mubr.f32.vlgmr.msra.gmra.mxu0 %v1855_v6  ;;  %885 = vadd.xlane.f32.xlu1 %v1855_v6  ;;  %v851_v42 = vld [vmem:[#allocation3] sm:$0xff] }
 0x206   : > { %1666 = vmatprep.mubr.f32.mxu1 %v1857_v43  ;;  %v791_v0 = vpop.permute.xlu1 %790  ;;  %v756_v55 = vpop.permute.xlu0 %755  ;;  %v867_v6 = vmul.f32 %v2637_v33, %v851_v42 }
 0x207   : > { %1870 = vpow2.f32 %v843_v21  ;;  %v816_v56 = vsub.f32 %v2484_v4, %v791_v0  ;;  %v809_v58 = vsub.f32 %v2488_v28, %v756_v55 }
 0x208   : > { %v1859_v59 = vpop.eup %1858  ;;  %1872 = vpow2.f32 %v829_v63  ;;  %v852_v63 = vld [vmem:[#allocation3 + $0x8] sm:$0xff] }
 0x209   : > { %v1861_v16 = vpop.eup %1860  ;;  %v845_v61 = vmul.f32 1.442695, %v816_v56  ;;  %v831_v17 = vmul.f32 1.442695, %v809_v58  ;;  %1667 = vmatmul.mubr.f32.vlgmr.msra.gmra.mxu1 %v1859_v59  ;;  %v868_v55 = vmul.f32 %v2627_v9, %v852_v63 }
 0x20a   : > { %887 = vadd.xlane.f32.xlu0 %v1861_v16  ;;  %1657 = vmatprep.mubr.f32.mxu0 %v1861_v16  ;;  %v796_v2 = vpop.permute.xlu1 %795  ;;  %v761_v3 = vpop.permute.xlu0 %760 }
 0x20b   : > { %1874 = vpow2.f32 %v845_v61  ;;  %v817_v5 = vsub.f32 %v2492_v36, %v796_v2  ;;  %v810_v7 = vsub.f32 %v2494_v37, %v761_v3 }
 0x20c   : > { %v1863_v8 = vpop.eup %1862  ;;  %1876 = vpow2.f32 %v831_v17  ;;  %v854_v17 = vld [vmem:[#allocation3 + $0x18] sm:$0xff] }
 0x20d   : > { %v1865_v4 = vpop.eup %1864  ;;  %v847_v10 = vmul.f32 1.442695, %v817_v5  ;;  %v833_v28 = vmul.f32 1.442695, %v810_v7  ;;  %1669 = vmatprep.mubr.f32.mxu1 %v1863_v8  ;;  %v870_v33 = vmul.f32 %v2655_v44, %v854_v17  ;;  %v855_v5 = vld [vmem:[#allocation3 + $0x20] sm:$0xff] }
 0x20e   : > { %889 = vadd.xlane.f32.xlu0 %v1865_v4  ;;  %1658 = vmatmul.mubr.f32.gmra.mxu0 %v1865_v4  ;;  %v801_v11 = vpop.permute.xlu1 %800  ;;  %v2714_v25 = vpop.permute.xlu0 %971  ;;  %v871_v9 = vmul.f32 %v2641_v38, %v855_v5  ;;  %v856_v4 = vld [vmem:[#allocation3 + $0x28] sm:$0xff] }
 0x20f   : > { %1878 = vpow2.f32 %v847_v10  ;;  %v818_v12 = vsub.f32 %v2498_v39, %v801_v11  ;;  %v857_v11 = vld [vmem:[#allocation3 + $0x30] sm:$0xff] }
 0x210   : > { %v1867_v13 = vpop.eup %1866  ;;  %1880 = vpow2.f32 %v833_v28  ;;  %v873_v44 = vmul.f32 %v2650_v62, %v857_v11 }
 0x211   : > { %v1869_v60 = vpop.eup %1868  ;;  %v849_v18 = vmul.f32 1.442695, %v818_v12  ;;  %1670 = vmatmul.mubr.f32.gmra.mxu1 %v1867_v13 }
 0x212   : > { %891 = vadd.xlane.f32.xlu1 %v1869_v60  ;;  %1660 = vmatprep.mubr.f32.mxu0 %v1869_v60  ;;  %v2710_v32 = vpop.permute.xlu1 %966  ;;  %v2718_v34 = vpop.permute.xlu0 %986  ;;  %v859_v60 = vld [vmem:[#allocation3 + $0x40] sm:$0xff] }
 0x213   : > { %1882 = vpow2.f32 %v849_v18  ;;  %v858_v18 = vld [vmem:[#allocation3 + $0x38] sm:$0xff]  ;;  %v875_v38 = vmul.f32 %v2658_v45, %v859_v60 }
 0x214   : > { %v1871_v36 = vpop.eup %1870  ;;  %1884 = vpow2.f32 %v721_v24  ;;  %v862_v45 = vld [vmem:[#allocation3 + $0x58] sm:$0xff] }
 0x215   : > { %v1873_v37 = vpop.eup %1872  ;;  %1672 = vmatprep.mubr.f32.mxu1 %v1871_v36  ;;  %1886 = vpow2.f32 %v719_v19 }
 0x216   : > { %893 = vadd.xlane.f32.xlu0 %v1873_v37  ;;  %1661 = vmatmul.mubr.f32.gmra.mxu0 %v1873_v37  ;;  %v2712_v57 = vpop.permute.xlu1 %976  ;;  %v874_v37 = vmul.f32 %v2667_v49, %v858_v18 }
 0x218   : > { %v1875_v22 = vpop.eup %1874  ;;  %v2722_v52 = vpop.permute.xlu0 %996 }
 0x219   : > { %v1877_v23 = vpop.eup %1876  ;;  %1673 = vmatmul.mubr.f32.gmra.mxu1 %v1875_v22 }
 0x21a   : > { %895 = vadd.xlane.f32.xlu1 %v1877_v23  ;;  %1663 = vmatprep.mubr.f32.mxu0 %v1877_v23  ;;  %v2716_v27 = vpop.permute.xlu1 %981 }
 0x21c   : > { %v1879_v14 = vpop.eup %1878  ;;  %v2726_v35 = vpop.permute.xlu0 %1006 }
 0x21d   : > { %v1881_v39 = vpop.eup %1880  ;;  %1675 = vmatprep.mubr.f32.mxu1 %v1879_v14 }
 0x21e   : > { %899 = vadd.xlane.f32.xlu1 %v1857_v43  ;;  %897 = vadd.xlane.f32.xlu0 %v1881_v39  ;;  %v2720_v1 = vpop.permute.xlu1 %991 }
 0x21f   : > { %1664 = vmatmul.mubr.f32.gmra.mxu0 %v1881_v39 }
 0x220   : > { %v1883_v15 = vpop.eup %1882  ;;  %v2730_v41 = vpop.permute.xlu0 %1016 }
 0x221   : > { %1676 = vmatmul.mubr.f32.gmra.mxu1 %v1883_v15  ;;  %v2704_v26 = vpop.eup %1884 }
 0x222   : > { %903 = vadd.xlane.f32.xlu1 %v1863_v8  ;;  %901 = vadd.xlane.f32.xlu0 %v1859_v59  ;;  %v2707_v30 = vpop.eup %1886  ;;  %v2724_v20 = vpop.permute.xlu1 %1001  ;;  %v853_v59 = vld [vmem:[#allocation3 + $0x10] sm:$0xff] }
 0x223   : > { %v869_v16 = vmul.f32 %v2645_v40, %v853_v59  ;;  %v872_v40 = vmul.f32 %v2661_v29, %v856_v4  ;;  %v861_v29 = vld [vmem:[#allocation3 + $0x50] sm:$0xff] }
 0x224   : > { %v2734_v47 = vpop.permute.xlu0 %1026  ;;  %v877_v62 = vmul.f32 %v2664_v48, %v861_v29  ;;  %v864_v48 = vld [vmem:[#allocation3 + $0x68] sm:$0xff] }
 0x226   : > { %907 = vadd.xlane.f32.xlu1 %v1871_v36  ;;  %905 = vadd.xlane.f32.xlu0 %v1867_v13  ;;  %v2728_v31 = vpop.permute.xlu1 %1011 }
 0x22a   : > { %911 = vadd.xlane.f32.xlu1 %v1879_v14  ;;  %909 = vadd.xlane.f32.xlu0 %v1875_v22  ;;  %v2732_v46 = vpop.permute.xlu1 %1021  ;;  %v860_v14 = vld [vmem:[#allocation3 + $0x48] sm:$0xff] }
 0x22b   : > { %v876_v24 = vmul.f32 %v2673_v51, %v860_v14 }
 0x22e   : > { %913 = vadd.xlane.f32.xlu0 %v1883_v15  ;;  %v2737_v43 = vpop.permute.xlu1 %1031 }
 0x23b   : > { %1041 = vperm.xlu1 %1823, %v2704_v26  }
 0x244   : > { %1036 = vperm.xlu0 %1822, %v2707_v30  }
 0x28a   : > { %v884_v21 = vpop.xlane.xlu0 %883 }
 0x28b   : > { %v915_v0 = vadd.f32 %v884_v21, %v867_v6  ;;  %v863_v6 = vld [vmem:[#allocation3 + $0x60] sm:$0xff] }
 0x28c   : > { %v879_v63 = vmul.f32 %v2670_v50, %v863_v6 }
 0x28d   : > { %932 = vst.msk [vmem:[#allocation3] sm:$0xff] %vm931_vm1, %v915_v0  ;;  %v878_v0 = vmul.f32 %v2676_v53, %v862_v45 }
 0x28e   : > { %v886_v56 = vpop.xlane.xlu1 %885 }
 0x28f   : > { %v916_v58 = vadd.f32 %v886_v56, %v868_v55 }
 0x291   : > { %933 = vst.msk [vmem:[#allocation3 + $0x8] sm:$0xff] %vm931_vm1, %v916_v58  ;;  %v865_v58 = vld [vmem:[#allocation3 + $0x70] sm:$0xff] }
 0x293   : > { %v888_v61 = vpop.xlane.xlu0 %887 }
 0x294   : > { %v917_v2 = vadd.f32 %v888_v61, %v869_v16  ;;  %v881_v16 = vmul.f32 %v2707_v30, %v865_v58  ;;  %v880_v61 = vmul.f32 %v2679_v54, %v864_v48  ;;  %v957_v54 = vld [vmem:[#allocation4 + $0x20] sm:$0xff] }
 0x296   : > { %934 = vst.msk [vmem:[#allocation3 + $0x10] sm:$0xff] %vm931_vm1, %v917_v2 }
 0x297   : > { %v890_v3 = vpop.xlane.xlu0 %889 }
 0x298   : > { %v918_v7 = vadd.f32 %v890_v3, %v870_v33  ;;  %v866_v33 = vld [vmem:[#allocation3 + $0x78] sm:$0xff] }
 0x299   : > { %v882_v53 = vmul.f32 %v2704_v26, %v866_v33 }
 0x29a   : > { %935 = vst.msk [vmem:[#allocation3 + $0x18] sm:$0xff] %vm931_vm1, %v918_v7 }
 0x29b   : > { %v892_v8 = vpop.xlane.xlu1 %891 }
 0x29c   : > { %v919_v10 = vadd.f32 %v892_v8, %v871_v9  ;;  %v949_v9 = vld [vmem:[#allocation4] sm:$0xff]  ;;  %v948_v8 = vld [vmem:[#allocation4 + $0x30] sm:$0xff] }
 0x29d   : > { %v1045_v30 = vmul.f32 %v2714_v25, %v949_v9 }
 0x29e   : > { %936 = vst.msk [vmem:[#allocation3 + $0x20] sm:$0xff] %vm931_vm1, %v919_v10  ;;  %v1044_v10 = vmul.f32 %v2710_v32, %v948_v8  ;;  %v959_v32 = vld [vmem:[#allocation4 + $0x38] sm:$0xff] }
 0x29f   : > { %v894_v28 = vpop.xlane.xlu0 %893  ;;  %v1055_v14 = vmul.f32 %v2732_v46, %v959_v32 }
 0x2a0   : > { %v920_v12 = vadd.f32 %v894_v28, %v872_v40  ;;  %v956_v28 = vld [vmem:[#allocation4 + $0x40] sm:$0xff] }
 0x2a1   : > { %v1052_v60 = vmul.f32 %v2726_v35, %v956_v28 }
 0x2a2   : > { %937 = vst.msk [vmem:[#allocation3 + $0x28] sm:$0xff] %vm931_vm1, %v920_v12  ;;  %v1053_v12 = vmul.f32 %v2728_v31, %v957_v54  ;;  %v958_v31 = vld [vmem:[#allocation4 + $0x10] sm:$0xff] }
 0x2a3   : > { %v896_v13 = vpop.xlane.xlu1 %895 }
 0x2a4   : > { %v921_v36 = vadd.f32 %v896_v13, %v873_v44  ;;  %v951_v13 = vld [vmem:[#allocation4 + $0x18] sm:$0xff] }
 0x2a6   : > { %938 = vst.msk [vmem:[#allocation3 + $0x30] sm:$0xff] %vm931_vm1, %v921_v36 }
 0x2a7   : > { %v900_v22 = vpop.xlane.xlu1 %899  ;;  %v898_v23 = vpop.xlane.xlu0 %897 }
 0x2a8   : > { %v923_v39 = vadd.f32 %v900_v22, %v875_v38  ;;  %v922_v15 = vadd.f32 %v898_v23, %v874_v37  ;;  %v950_v38 = vld [vmem:[#allocation4 + $0x58] sm:$0xff]  ;;  %v1047_v37 = vmul.f32 %v2716_v27, %v951_v13  ;;  %v952_v27 = vld [vmem:[#allocation4 + $0x50] sm:$0xff] }
 0x2a9   : > { %v1046_v23 = vmul.f32 %v2712_v57, %v950_v38  ;;  %v961_v57 = vld [vmem:[#allocation4 + $0x70] sm:$0xff]  ;;  %v1048_v46 = vmul.f32 %v2718_v34, %v952_v27 }
 0x2aa   : > { %940 = vst.msk [vmem:[#allocation3 + $0x40] sm:$0xff] %vm931_vm1, %v923_v39  ;;  %939 = vst.msk [vmem:[#allocation3 + $0x38] sm:$0xff] %vm931_vm1, %v922_v15 }
 0x2ab   : > { %v904_v19 = vpop.xlane.xlu1 %903  ;;  %v902_v42 = vpop.xlane.xlu0 %901 }
 0x2ac   : > { %v925_v21 = vadd.f32 %v904_v19, %v877_v62  ;;  %v924_v49 = vadd.f32 %v902_v42, %v876_v24  ;;  %v953_v62 = vld [vmem:[#allocation4 + $0x68] sm:$0xff]  ;;  %v1054_v24 = vmul.f32 %v2730_v41, %v958_v31 }
 0x2ad   : > { %v1049_v45 = vmul.f32 %v2720_v1, %v953_v62 }
 0x2ae   : > { %942 = vst.msk [vmem:[#allocation3 + $0x50] sm:$0xff] %vm931_vm1, %v925_v21  ;;  %941 = vst.msk [vmem:[#allocation3 + $0x48] sm:$0xff] %vm931_vm1, %v924_v49  ;;  %v960_v49 = vld [vmem:[#allocation4 + $0x60] sm:$0xff] }
 0x2af   : > { %v908_v55 = vpop.xlane.xlu1 %907  ;;  %v906_v56 = vpop.xlane.xlu0 %905  ;;  %v1056_v58 = vmul.f32 %v2734_v47, %v960_v49 }
 0x2b0   : > { %v927_v59 = vadd.f32 %v908_v55, %v879_v63  ;;  %v926_v51 = vadd.f32 %v906_v56, %v878_v0  ;;  %v1057_v0 = vmul.f32 %v2737_v43, %v961_v57 }
 0x2b2   : > { %944 = vst.msk [vmem:[#allocation3 + $0x60] sm:$0xff] %vm931_vm1, %v927_v59  ;;  %943 = vst.msk [vmem:[#allocation3 + $0x58] sm:$0xff] %vm931_vm1, %v926_v51  ;;  %v955_v59 = vld [vmem:[#allocation4 + $0x48] sm:$0xff] }
 0x2b3   : > { %v912_v17 = vpop.xlane.xlu1 %911  ;;  %v910_v2 = vpop.xlane.xlu0 %909  ;;  %v1051_v34 = vmul.f32 %v2724_v20, %v955_v59 }
 0x2b4   : > { %v929_v50 = vadd.f32 %v912_v17, %v881_v16  ;;  %v928_v3 = vadd.f32 %v910_v2, %v880_v61  ;;  %v954_v16 = vld [vmem:[#allocation4 + $0x8] sm:$0xff]  ;;  %v962_v2 = vld [vmem:[#allocation4 + $0x78] sm:$0xff] }
 0x2b5   : > { %v963_v61 = vld [vmem:[#allocation4 + $0x28] sm:$0xff] }
 0x2b6   : > { %946 = vst.msk [vmem:[#allocation3 + $0x70] sm:$0xff] %vm931_vm1, %v929_v50  ;;  %945 = vst.msk [vmem:[#allocation3 + $0x68] sm:$0xff] %vm931_vm1, %v928_v3  ;;  %v1050_v50 = vmul.f32 %v2722_v52, %v954_v16 }
 0x2b7   : > { %v914_v5 = vpop.xlane.xlu0 %913  ;;  %v1042_v17 = vpop.permute.xlu1 %1041 }
 0x2b8   : > { %v930_v7 = vadd.f32 %v914_v5, %v882_v53  ;;  %v1059_v3 = vmul.f32 %v1042_v17, %v963_v61 }
 0x2ba   : > { %947 = vst.msk [vmem:[#allocation3 + $0x78] sm:$0xff] %vm931_vm1, %v930_v7 }
 0x2bf   : > { %v1037_v43 = vpop.permute.xlu0 %1036 }
 0x2c0   : > { %v1058_v7 = vmul.f32 %v1037_v43, %v962_v2 }
 0x2c5   : > { %v1656_v4 = vpop.f32.mrf.mxu0 }
 0x2c6   : > { %v1222_v40 = vadd.f32 %v1656_v4, %v1045_v30 }
 0x2c7   : > { %v1142_v11 = vpop.f32.mrf.mxu0 }
 0x2c8   : > { %1238 = vst [vmem:[#allocation4] sm:$0xff] %v1222_v40  ;;  %v1221_v44 = vadd.f32 %v1142_v11, %v1044_v10 }
 0x2c9   : > { %v1668_v26 = vpop.f32.mrf.mxu1 }
 0x2ca   : > { %1237 = vst [vmem:[#allocation4 + $0x30] sm:$0xff] %v1221_v44  ;;  %v1230_v18 = vadd.f32 %v1668_v26, %v1053_v12 }
 0x2cb   : > { %v1182_v36 = vpop.f32.mrf.mxu1 }
 0x2cc   : > { %1246 = vst [vmem:[#allocation4 + $0x20] sm:$0xff] %v1230_v18  ;;  %v1229_v25 = vadd.f32 %v1182_v36, %v1052_v60 }
 0x2ce   : > { %1245 = vst [vmem:[#allocation4 + $0x40] sm:$0xff] %v1229_v25  ;;  %v1659_v22 = vpop.f32.mrf.mxu0 }
 0x2cf   : > { %v1224_v29 = vadd.f32 %v1659_v22, %v1047_v37 }
 0x2d0   : > { %v1152_v39 = vpop.f32.mrf.mxu0 }
 0x2d1   : > { %1240 = vst [vmem:[#allocation4 + $0x18] sm:$0xff] %v1224_v29  ;;  %v1223_v35 = vadd.f32 %v1152_v39, %v1046_v23  ;;  %v1671_v15 = vpop.f32.mrf.mxu1 }
 0x2d2   : > { %v1232_v19 = vadd.f32 %v1671_v15, %v1055_v14 }
 0x2d3   : > { %1239 = vst [vmem:[#allocation4 + $0x58] sm:$0xff] %v1223_v35  ;;  %v1192_v42 = vpop.f32.mrf.mxu1 }
 0x2d4   : > { %1248 = vst [vmem:[#allocation4 + $0x38] sm:$0xff] %v1232_v19  ;;  %v1231_v6 = vadd.f32 %v1192_v42, %v1054_v24 }
 0x2d6   : > { %1247 = vst [vmem:[#allocation4 + $0x10] sm:$0xff] %v1231_v6  ;;  %v1662_v21 = vpop.f32.mrf.mxu0 }
 0x2d7   : > { %v1226_v63 = vadd.f32 %v1662_v21, %v1049_v45 }
 0x2d8   : > { %v1162_v55 = vpop.f32.mrf.mxu0 }
 0x2d9   : > { %1242 = vst [vmem:[#allocation4 + $0x68] sm:$0xff] %v1226_v63  ;;  %v1225_v41 = vadd.f32 %v1162_v55, %v1048_v46  ;;  %v1674_v56 = vpop.f32.mrf.mxu1 }
 0x2da   : > { %v1234_v48 = vadd.f32 %v1674_v56, %v1057_v0 }
 0x2db   : > { %1241 = vst [vmem:[#allocation4 + $0x50] sm:$0xff] %v1225_v41  ;;  %v1202_v51 = vpop.f32.mrf.mxu1 }
 0x2dc   : > { %1250 = vst [vmem:[#allocation4 + $0x70] sm:$0xff] %v1234_v48  ;;  %v1233_v1 = vadd.f32 %v1202_v51, %v1056_v58 }
 0x2de   : > { %1249 = vst [vmem:[#allocation4 + $0x60] sm:$0xff] %v1233_v1 }
 0x2df   : > { %v1665_v33 = vpop.f32.mrf.mxu0 }
 0x2e0   : > { %v1228_v53 = vadd.f32 %v1665_v33, %v1051_v34 }
 0x2e1   : > { %v1172_v47 = vpop.f32.mrf.mxu0  ;;  %v1677_v5 = vpop.f32.mrf.mxu1 }
 0x2e2   : > { %1244 = vst [vmem:[#allocation4 + $0x48] sm:$0xff] %v1228_v53  ;;  %v1227_v9 = vadd.f32 %v1172_v47, %v1050_v50  ;;  %v1236_v8 = vadd.f32 %v1677_v5, %v1059_v3  ;;  %1272 = sbr.rel (%p1583_p9) target bundleno = 914 (0x392), region = 48 }
 0x2e3   : > { %v1212_v30 = vpop.f32.mrf.mxu1 }
 0x2e4   : > { %1243 = vst [vmem:[#allocation4 + $0x8] sm:$0xff] %v1227_v9  ;;  %1252 = vst [vmem:[#allocation4 + $0x28] sm:$0xff] %v1236_v8  ;;  %v1235_v54 = vadd.f32 %v1212_v30, %v1058_v7 }
 0x2e6   : > { %1251 = vst [vmem:[#allocation4 + $0x78] sm:$0xff] %v1235_v54 }
 0x2e7   : > { %v1275_v20 = vld [vmem:[#allocation3 + $0x10] sm:$0xff]  ;;  %v1273_v4 = vld [vmem:[#allocation3] sm:$0xff]  ;;  %v1276_v10 = vld [vmem:[#allocation3 + $0x18] sm:$0xff]  ;;  %v2079_v52 = vmov 0  }
 0x2e8   : > { %1889 = vset.pattern.permute.xlu1 %v2079_v52  ;;  %1888 = vset.pattern.permute.xlu0 %v2079_v52  ;;  %1890 = vrcp.f32 %v1275_v20  ;;  %v1274_v40 = vld [vmem:[#allocation3 + $0x8] sm:$0xff]  ;;  %v1277_v11 = vld [vmem:[#allocation3 + $0x20] sm:$0xff]  ;;  %v1280_v12 = vld [vmem:[#allocation3 + $0x38] sm:$0xff] }
 0x2e9   : > { %1892 = vrcp.f32 %v1273_v4  ;;  %v1278_v28 = vld [vmem:[#allocation3 + $0x28] sm:$0xff]  ;;  %v1279_v44 = vld [vmem:[#allocation3 + $0x30] sm:$0xff]  ;;  %v1281_v13 = vld [vmem:[#allocation3 + $0x40] sm:$0xff] }
 0x2ea   : > { %1894 = vrcp.f32 %v1276_v10  ;;  %v1282_v26 = vld [vmem:[#allocation3 + $0x48] sm:$0xff]  ;;  %v1284_v38 = vld [vmem:[#allocation3 + $0x58] sm:$0xff]  ;;  %v1283_v37 = vld [vmem:[#allocation3 + $0x50] sm:$0xff] }
 0x2eb   : > { %1896 = vrcp.f32 %v1274_v40  ;;  %v1286_v22 = vld [vmem:[#allocation3 + $0x68] sm:$0xff]  ;;  %v1285_v31 = vld [vmem:[#allocation3 + $0x60] sm:$0xff]  ;;  %v1288_v14 = vld [vmem:[#allocation3 + $0x78] sm:$0xff] }
 0x2ec   : > { %1898 = vrcp.f32 %v1278_v28  ;;  %v1287_v35 = vld [vmem:[#allocation3 + $0x70] sm:$0xff]  ;;  %v1307_v57 = vld [vmem:[#allocation4 + $0x58] sm:$0xff]  ;;  %v1306_v41 = vld [vmem:[#allocation4] sm:$0xff] }
 0x2ed   : > { %1900 = vrcp.f32 %v1277_v11  ;;  %v1305_v21 = vld [vmem:[#allocation4 + $0x30] sm:$0xff]  ;;  %v1308_v55 = vld [vmem:[#allocation4 + $0x18] sm:$0xff]  ;;  %v1310_v51 = vld [vmem:[#allocation4 + $0x68] sm:$0xff] }
 0x2ee   : > { %1902 = vrcp.f32 %v1280_v12  ;;  %v1309_v1 = vld [vmem:[#allocation4 + $0x50] sm:$0xff]  ;;  %v1312_v2 = vld [vmem:[#allocation4 + $0x48] sm:$0xff]  ;;  %v1314_v47 = vld [vmem:[#allocation4 + $0x20] sm:$0xff] }
 0x2ef   : > { %1904 = vrcp.f32 %v1279_v44  ;;  %v1311_v43 = vld [vmem:[#allocation4 + $0x8] sm:$0xff]  ;;  %v1313_v5 = vld [vmem:[#allocation4 + $0x40] sm:$0xff]  ;;  %v1316_v54 = vld [vmem:[#allocation4 + $0x38] sm:$0xff] }
 0x2f0   : > { %1906 = vrcp.f32 %v1282_v26  ;;  %v1315_v20 = vld [vmem:[#allocation4 + $0x10] sm:$0xff]  ;;  %v1317_v11 = vld [vmem:[#allocation4 + $0x60] sm:$0xff] }
 0x2f1   : > { %1908 = vrcp.f32 %v1281_v13  ;;  %v1318_v28 = vld [vmem:[#allocation4 + $0x70] sm:$0xff] }
 0x2f2   : > { %1910 = vrcp.f32 %v1284_v38 }
 0x2f3   : > { %1912 = vrcp.f32 %v1283_v37 }
 0x2f4   : > { %1914 = vrcp.f32 %v1286_v22 }
 0x2f5   : > { %v1891_v60 = vpop.eup %1890  ;;  %1916 = vrcp.f32 %v1285_v31 }
 0x2f6   : > { %v1893_v18 = vpop.eup %1892  ;;  %1333 = vperm.xlu1 %1889, %v1891_v60   ;;  %1918 = vrcp.f32 %v1288_v14  ;;  %v1320_v60 = vld [vmem:[#allocation4 + $0x28] sm:$0xff] }
 0x2f7   : > { %v1895_v36 = vpop.eup %1894  ;;  %1323 = vperm.xlu0 %1888, %v1893_v18   ;;  %1920 = vrcp.f32 %v1287_v35  ;;  %v1319_v18 = vld [vmem:[#allocation4 + $0x78] sm:$0xff] }
 0x2f8   : > { %v1897_v25 = vpop.eup %1896 }
 0x2f9   : > { %v1899_v32 = vpop.eup %1898 }
 0x2fa   : > { %1338 = vperm.xlu1 %1889, %v1895_v36   ;;  %v1901_v23 = vpop.eup %1900 }
 0x2fb   : > { %1328 = vperm.xlu0 %1888, %v1897_v25   ;;  %v1903_v29 = vpop.eup %1902 }
 0x2fc   : > { %v1905_v39 = vpop.eup %1904 }
 0x2fd   : > { %v1907_v15 = vpop.eup %1906 }
 0x2fe   : > { %1348 = vperm.xlu1 %1889, %v1899_v32   ;;  %v1909_v62 = vpop.eup %1908 }
 0x2ff   : > { %1343 = vperm.xlu0 %1888, %v1901_v23   ;;  %v1911_v24 = vpop.eup %1910 }
 0x300   : > { %v1913_v19 = vpop.eup %1912 }
 0x301   : > { %v1915_v42 = vpop.eup %1914 }
 0x302   : > { %1358 = vperm.xlu1 %1889, %v1903_v29   ;;  %v1917_v27 = vpop.eup %1916 }
 0x303   : > { %1353 = vperm.xlu0 %1888, %v1905_v39   ;;  %v1919_v6 = vpop.eup %1918 }
 0x304   : > { %v1921_v45 = vpop.eup %1920 }
 0x306   : > { %1368 = vperm.xlu1 %1889, %v1907_v15  }
 0x307   : > { %1363 = vperm.xlu0 %1888, %v1909_v62  }
 0x30a   : > { %1378 = vperm.xlu1 %1889, %v1911_v24  }
 0x30b   : > { %1373 = vperm.xlu0 %1888, %v1913_v19  }
 0x30e   : > { %1388 = vperm.xlu1 %1889, %v1915_v42  }
 0x30f   : > { %1383 = vperm.xlu0 %1888, %v1917_v27  }
 0x312   : > { %1398 = vperm.xlu1 %1889, %v1919_v6  }
 0x313   : > { %1393 = vperm.xlu0 %1888, %v1921_v45  }
 0x371   : > { %v1334_v46 = vpop.permute.xlu1 %1333 }
 0x372   : > { %v1403_v49 = vmul.f32 %v1334_v46, %v1307_v57  ;;  %v1324_v63 = vpop.permute.xlu0 %1323 }
 0x373   : > { %v1401_v0 = vmul.f32 %v1324_v63, %v1305_v21 }
 0x374   : > { %1419 = vst [vmem:[%s2255_s24 + $0x10] sm:$0xff] %v1403_v49 }
 0x375   : > { %1417 = vst [vmem:[%s2255_s24] sm:$0xff] %v1401_v0  ;;  %v1339_v56 = vpop.permute.xlu1 %1338 }
 0x376   : > { %v1404_v58 = vmul.f32 %v1339_v56, %v1308_v55  ;;  %v1329_v48 = vpop.permute.xlu0 %1328 }
 0x377   : > { %v1402_v59 = vmul.f32 %v1329_v48, %v1306_v41 }
 0x378   : > { %1420 = vst [vmem:[%s2255_s24 + $0x18] sm:$0xff] %v1404_v58 }
 0x379   : > { %1418 = vst [vmem:[%s2255_s24 + $0x8] sm:$0xff] %v1402_v59  ;;  %v1349_v16 = vpop.permute.xlu1 %1348 }
 0x37a   : > { %v1406_v61 = vmul.f32 %v1349_v16, %v1310_v51  ;;  %v1344_v17 = vpop.permute.xlu0 %1343 }
 0x37b   : > { %v1405_v34 = vmul.f32 %v1344_v17, %v1309_v1 }
 0x37c   : > { %1422 = vst [vmem:[%s2255_s24 + $0x28] sm:$0xff] %v1406_v61 }
 0x37d   : > { %1421 = vst [vmem:[%s2255_s24 + $0x20] sm:$0xff] %v1405_v34  ;;  %v1359_v33 = vpop.permute.xlu1 %1358 }
 0x37e   : > { %v1408_v50 = vmul.f32 %v1359_v33, %v1312_v2  ;;  %v1354_v3 = vpop.permute.xlu0 %1353 }
 0x37f   : > { %v1407_v53 = vmul.f32 %v1354_v3, %v1311_v43 }
 0x380   : > { %1424 = vst [vmem:[%s2255_s24 + $0x38] sm:$0xff] %v1408_v50 }
 0x381   : > { %1423 = vst [vmem:[%s2255_s24 + $0x30] sm:$0xff] %v1407_v53  ;;  %v1369_v7 = vpop.permute.xlu1 %1368 }
 0x382   : > { %v1410_v9 = vmul.f32 %v1369_v7, %v1314_v47  ;;  %v1364_v8 = vpop.permute.xlu0 %1363 }
 0x383   : > { %v1409_v30 = vmul.f32 %v1364_v8, %v1313_v5 }
 0x384   : > { %1426 = vst [vmem:[%s2255_s24 + $0x48] sm:$0xff] %v1410_v9 }
 0x385   : > { %1425 = vst [vmem:[%s2255_s24 + $0x40] sm:$0xff] %v1409_v30  ;;  %v1379_v4 = vpop.permute.xlu1 %1378 }
 0x386   : > { %v1412_v10 = vmul.f32 %v1379_v4, %v1316_v54  ;;  %v1374_v52 = vpop.permute.xlu0 %1373 }
 0x387   : > { %v1411_v40 = vmul.f32 %v1374_v52, %v1315_v20 }
 0x388   : > { %1428 = vst [vmem:[%s2255_s24 + $0x58] sm:$0xff] %v1412_v10 }
 0x389   : > { %1427 = vst [vmem:[%s2255_s24 + $0x50] sm:$0xff] %v1411_v40  ;;  %v1389_v12 = vpop.permute.xlu1 %1388 }
 0x38a   : > { %v1414_v44 = vmul.f32 %v1389_v12, %v1318_v28  ;;  %v1384_v26 = vpop.permute.xlu0 %1383 }
 0x38b   : > { %v1413_v13 = vmul.f32 %v1384_v26, %v1317_v11 }
 0x38c   : > { %1430 = vst [vmem:[%s2255_s24 + $0x68] sm:$0xff] %v1414_v44 }
 0x38d   : > { %1429 = vst [vmem:[%s2255_s24 + $0x60] sm:$0xff] %v1413_v13  ;;  %v1399_v36 = vpop.permute.xlu1 %1398 }
 0x38e   : > { %v1416_v38 = vmul.f32 %v1399_v36, %v1320_v60  ;;  %v1394_v25 = vpop.permute.xlu0 %1393 }
 0x38f   : > { %v1415_v37 = vmul.f32 %v1394_v25, %v1319_v18 }
 0x390   : > { %1432 = vst [vmem:[%s2255_s24 + $0x78] sm:$0xff] %v1416_v38 }
 0x391   : > { %1431 = vst [vmem:[%s2255_s24 + $0x70] sm:$0xff] %v1415_v37 }
 0x392 PF: > { %s1589_s2 = sshll.u32 %s2058_s22, 11  ;;  %s1447_s10 = sshll.u32 %s2255_s24, 4  ;;  %s2808_s10 = int_to_ptr.vmem [resolvable:$true] %s1447_s10 }
 0x393   : > { %s2805_s13 = scalar_lea.hbm %s2876_s4, %s1589_s2  ;;  %s2921_s6 = sand.u32 1, %s2034_s16  }
 0x394   : > { %s2812_s26 = scalar_lea.sflag [#allocation7], %s2921_s6  ;;  %s1950_s8 = scalar_lea.vmem %s2808_s10, 2048 }
 0x395   : > { %p1951_p3 = scmp.ne.s32.totalorder %s2808_s10, %s1950_s8  ;;  %s2080_s22 = smov [#allocation8]  }
 0x396   : > { %s1954_s9 = sshll.u32 %s2080_s22, 4  ;;  %s1955_s9 = int_to_ptr.vmem [resolvable:$false] %s1954_s9 }
 0x397   : > { %p1952_p10 = pnand %p1951_p3, %p2190_p12  ;;  %s1956_s5 = scalar_lea.vmem %s1955_s9, 4096 }
 0x398   : > { %p1957_p13 = scmp.lt.s32.totalorder %s2808_s10, %s1955_s9  ;;  %p1958_p0 = scmp.lt.s32.totalorder %s1956_s5, %s1950_s8 }
 0x399   : > { %p1953_p11 = pneg %p1952_p10 }
 0x39a   : > { %p1959_p1 = por %p1958_p0, %p1957_p13 }
 0x39c   : > { %p1960_p5 = pnand %p1959_p1, %p1953_p11 }
 0x39e   : > { %1963 = shalt.err (!%p1960_p5)
}
 0x39f   : > { %s1964_s24 = scalar_lea.hbm %s2805_s13, 2048  ;;  %s1968_s30 = scalar_lea.hbm %s2876_s4, 6144 }
 0x3a0   : > { %p1965_p4 = scmp.ne.s32.totalorder %s2805_s13, %s1964_s24  ;;  %p1969_p8 = scmp.lt.s32.totalorder %s2805_s13, %s2876_s4 }
 0x3a1   : > { %p1970_p9 = scmp.lt.s32.totalorder %s1968_s30, %s1964_s24 }
 0x3a2   : > { %p1966_p6 = pnand %p1965_p4, %p2190_p12 }
 0x3a3   : > { %p1971_p3 = por %p1970_p9, %p1969_p8 }
 0x3a4   : > { %p1967_p7 = pneg %p1966_p6 }
 0x3a6   : > { %p1972_p10 = pnand %p1971_p3, %p1967_p7 }
 0x3a8   : > { %1975 = shalt.err (!%p1972_p10)
}
 0x3a9   : > { %s2081_s29 = smov 128   ;;  %s2082_s12 = smov 8  }
 0x3aa   : > { %1713 = dma.vmem_to_hbm [thread:$0]  (%p2190_p12), %s2808_s10, 2048, %s2805_s13, %s2812_s26, %s2081_s29, %s2081_s29, %s2082_s12  }
 0x3ab PF: > { %p1724_p11 = scmp.ge.s32.totalorder %s2070_s25, 2  ;;  %s1462_s2 = sand.u32 1, %s2030_s15  }
 0x3ac   : > { %s1463_s21 = scalar_lea.sflag [#allocation7], %s1462_s2 }
 0x3ad   : > { %p1720_p13 = pnand %p1724_p11, %p2203_p2 }
 0x3af   : > { %p1721_p0 = pneg %p1720_p13 }
 0x3b1   : > { %2025 = dma.done.wait (%p1721_p0), %s1463_s21, 2048  }
 0x3b2   : > { %2027 = vsyncadd (%p1721_p0), %s1463_s21, 4294965248  ;;  %s20_s25 = sadd.s32 1, %s2070_s25   ;;  %s2922_s27 = sld [smem:[#allocation15_spill]] }
 0x3b3   : > { %p17_p1 = scmp.ge.s32.totalorder %s20_s25, 11   ;;  %s2923_s11 = sld [smem:[#allocation11_spill]] }
 0x3b4   : > { %s2924_s20 = sld [smem:[#allocation16_spill]]  ;;  %s2928_s15 = smov %s2034_s16 }
 0x3b5   : > { %s2925_s22 = sld [smem:[#allocation12_spill]]  ;;  %s2929_s16 = smov %s2038_s17 }
 0x3b6   : > { %s2926_s13 = sld [smem:[#allocation13_spill]]  ;;  %s2931_s18 = smov %s2046_s19 }
 0x3b7   : > { %s2927_s24 = sld [smem:[#allocation14_spill]]  ;;  %s2933_s21 = smov %s2062_s23 }
 0x3b8   : > { %s2930_s17 = smov %s2922_s27  ;;  %19 = sbr.rel (!%p17_p1) target bundleno = 11 (0xb), region = 98 }
 0x3b9   : > { %s2932_s19 = smov %s2923_s11 }
 0x3bc   : > { %s2934_s23 = smov %s2926_s13 }
 0x3bd   :  { %1468 = vsyncpa [#allocation6], 1 }
 0x3be   :  { %1470 = vsyncpa [#allocation6 + $0x1], 1 }
 0x3bf   :  { %1471 = vsyncpa [#allocation7], 1 }
 0x3c0   :  { %1473 = vsyncpa [#allocation7 + $0x1], 1 }

</bundles_post_ra>
